<compile_context>
chip_gen: v7x
topology: tpu7x:2x2x1
jax: 0.10.0
libtpu: 0.0.40
codegen_flags: <defaults>
</compile_context>

<pallas_src>
import functools

import jax
import jax.numpy as jnp
from jax import lax
from jax.experimental import pallas as pl
from jax.experimental.pallas import tpu as pltpu


def _round_up(x, m):
    return ((x + m - 1) // m) * m


def _vmem_limit_bytes():
    # ~3/4 of physical VMEM: 96 MiB on v5e/v6e (128 MiB), 48 MiB on v7x (64 MiB),
    # leaving compiler scratch headroom.
    default_cap = 64 * 1024 * 1024
    try:
        cap = int(getattr(pltpu.get_tpu_info(), "vmem_capacity_bytes", default_cap))
    except Exception:
        cap = default_cap
    return min(cap * 3 // 4, 96 * 1024 * 1024)


# ---------------------------------------------------------------------------
# Fused kernel: grid = (batch_tile, expert).  At e == 0 compute gating into a
# VMEM scratch and initialize the f32 accumulator with the selected experts'
# bias contribution; every step streams one (D, D) expert weight (Pallas
# double-buffers the DMA behind the MXU matmul) and accumulates; the output
# tile is written lane-dense at e == E-1.
# ---------------------------------------------------------------------------
def _moe_kernel(x_ref, gw_ref, gb_ref, eb_ref, ew_ref, o_ref, g_ref, acc_ref,
                *, top_k: int):
    e = pl.program_id(1)
    num_experts = pl.num_programs(1)

    @pl.when(e == 0)
    def _gate_and_init():
        # ---- gating: logits -> softmax -> top-k sparse gates (tb, E) ----
        logits = lax.dot_general(
            x_ref[...], gw_ref[...],                       # x @ gate_w.T
            dimension_numbers=(((1,), (1,)), ((), ())),
            preferred_element_type=jnp.float32)
        logits = logits + gb_ref[...].astype(jnp.float32)

        m = jnp.max(logits, axis=-1, keepdims=True)
        p = jnp.exp(logits - m)
        w = p * pl.reciprocal(jnp.sum(p, axis=-1, keepdims=True), approx=False)

        tb, ne = w.shape
        ids = lax.broadcasted_iota(jnp.int32, (tb, ne), 1)
        g = jnp.zeros_like(w)
        remaining = w
        for _ in range(top_k):                             # small static unroll
            mx = jnp.max(remaining, axis=-1, keepdims=True)
            sel = jnp.min(jnp.where(remaining == mx, ids, ne),
                          axis=-1, keepdims=True)          # first occurrence on ties
            first = ids == sel
            g = jnp.where(first, remaining, g)
            remaining = jnp.where(first, -jnp.inf, remaining)
        g_ref[...] = g

        # Bias contribution of all selected experts in one tiny matmul:
        #   sum_e g[i, e] * bias_e  ==  g @ expert_b
        acc_ref[...] = jnp.dot(g, eb_ref[...].astype(jnp.float32),
                               preferred_element_type=jnp.float32)

    # ---- expert matmul for expert `e` (dense over experts; see TODO) ----
    lane = lax.broadcasted_iota(jnp.int32, g_ref.shape, 1)
    g_col = jnp.sum(jnp.where(lane == e, g_ref[...], 0.0),
                    axis=-1, keepdims=True)                # (tb, 1) f32
    y = lax.dot_general(
        x_ref[...], ew_ref[0],                             # x @ W_e.T (nn.Linear layout)
        dimension_numbers=(((1,), (1,)), ((), ())),
        preferred_element_type=jnp.float32)                # (tb, D) f32
    acc_ref[...] += g_col * y

    @pl.when(e == num_experts - 1)
    def _finalize():
        o_ref[...] = acc_ref[...].astype(o_ref.dtype)


# ---------------------------------------------------------------------------
# Wrapper
# ---------------------------------------------------------------------------
def moe_layer(x, gate_w, gate_b, expert_w, expert_b, *, top_k=2, block_b=768):
    """x: (B, D); gate_w: (E, D); gate_b: (E,); expert_w: (E, D, D);
    expert_b: (E, D).  Weights follow nn.Linear (out_features, in_features).
    Pass bf16 x / weights for the fast MXU + half-DMA path; accumulation is f32."""
    B, D = x.shape
    E = gate_w.shape[0]
    assert 1 <= top_k <= E, "top_k must be in [1, num_experts]"
    assert expert_w.shape == (E, D, D) and expert_b.shape == (E, D)
    assert gate_b.shape == (E,)

    x_bytes = jnp.dtype(x.dtype).itemsize
    w_bytes = jnp.dtype(expert_w.dtype).itemsize
    vmem_limit = _vmem_limit_bytes()

    # Batch tile: MXU-aligned (>= 128 rows), large by default to amortize
    # expert-weight streaming; shrunk if the working set would overflow VMEM.
    tb = min(_round_up(block_b, 128), _round_up(B, 128))

    def vmem_need(t):
        return (2 * t * D * x_bytes            # x tile (double-buffered)
                + 2 * t * D * x_bytes          # output tile
                + 2 * D * D * w_bytes          # streamed expert weight (double-buffered)
                + t * D * 4 + t * E * 4        # f32 accumulator + gate scratch
                + 2 * (2 * E * D * w_bytes + E * 4))  # gate_w, expert_b, gate_b

    while tb > 128 and vmem_need(tb) > int(0.8 * vmem_limit):
        tb = max(128, _round_up(tb // 2, 128))

    B_pad = _round_up(B, tb)
    num_tiles = B_pad // tb
    # v7x megacore: keep >= 2 tiles on the "parallel" batch axis when possible.
    if num_tiles == 1 and tb >= 256:
        tb //= 2
        num_tiles = 2

    # Padded rows run through gating/experts with zero inputs and are sliced off.
    x_p = jnp.pad(x, ((0, B_pad - B), (0, 0))) if B_pad != B else x

    cost = pl.CostEstimate(
        flops=int(2 * B_pad * D * D * E        # dense-over-experts matmuls
                  + 2 * B_pad * D * E          # gating logits
                  + 2 * B_pad * E * D),        # bias fold-in matmul
        transcendentals=int(B_pad * E),
        bytes_accessed=int(num_tiles * E * D * D * w_bytes   # weights re-streamed per tile
                           + 2 * B_pad * D * x_bytes         # x read + out write
                           + 2 * E * D * w_bytes + E * 4),
    )

    out = pl.pallas_call(
        functools.partial(_moe_kernel, top_k=top_k),
        out_shape=jax.ShapeDtypeStruct((B_pad, D), x.dtype),
        grid=(num_tiles, E),
        in_specs=[
            pl.BlockSpec((tb, D), lambda b, e: (b, 0)),        # x tile (resident over e)
            pl.BlockSpec((E, D), lambda b, e: (0, 0)),         # gate weights (fetched once)
            pl.BlockSpec((1, E), lambda b, e: (0, 0)),         # gate bias
            pl.BlockSpec((E, D), lambda b, e: (0, 0)),         # expert biases (tiny)
            pl.BlockSpec((1, D, D), lambda b, e: (e, 0, 0)),   # streamed expert weight
        ],
        out_specs=pl.BlockSpec((tb, D), lambda b, e: (b, 0)),
        scratch_shapes=[
            pltpu.VMEM((tb, E), jnp.float32),   # per-tile sparse gates
            pltpu.VMEM((tb, D), jnp.float32),   # f32 accumulator
        ],
        compiler_params=pltpu.CompilerParams(
            dimension_semantics=("parallel", "arbitrary"),
            vmem_limit_bytes=int(vmem_limit),
        ),
        cost_estimate=cost,
    )(x_p, gate_w, gate_b.reshape(1, E), expert_b, expert_w)

    return out[:B] if B_pad != B else out


# ---------------------------------------------------------------------------
# Pure-JAX reference (matches the PyTorch module: raw softmax top-k weights,
# no renormalization).
# ---------------------------------------------------------------------------
def _reference(x, gate_w, gate_b, expert_w, expert_b, top_k=2):
    logits = x @ gate_w.T + gate_b
    w = jax.nn.softmax(logits, axis=-1)
    topk_w, topk_i = jax.lax.top_k(w, top_k)
    out = jnp.zeros_like(x)
    for j in range(top_k):
        y = jnp.einsum("bd,bod->bo", x, expert_w[topk_i[:, j]]) + expert_b[topk_i[:, j]]
        out = out + topk_w[:, j:j + 1] * y
    return out


if __name__ == "__main__":
    def make(key, B, D, E):
        k1, k2, k3, k4, k5 = jax.random.split(key, 5)
        x = jax.random.normal(k1, (B, D), dtype=jnp.float32)
        gate_w = jax.random.normal(k2, (E, D), dtype=jnp.float32) * 0.1
        gate_b = jax.random.normal(k3, (E,), dtype=jnp.float32) * 0.1
        expert_w = jax.random.normal(k4, (E, D, D), dtype=jnp.float32) * 0.1
        expert_b = jax.random.normal(k5, (E, D), dtype=jnp.float32) * 0.1
        return x, gate_w, gate_b, expert_w, expert_b

    # Small single-tile case (B=16 padded to one 128-row MXU-aligned tile).
    args = make(jax.random.PRNGKey(0), 16, 128, 4)
    out = jax.block_until_ready(moe_layer(*args, top_k=2))
    ref = _reference(*args, top_k=2)
    assert jnp.allclose(out, ref, atol=1e-3, rtol=1e-3), "mismatch (single tile)"

    # Multi-tile case exercising batch padding and the 2-tile megacore split.
    args = make(jax.random.PRNGKey(1), 272, 128, 4)
    out = jax.block_until_ready(moe_layer(*args, top_k=2))
    ref = _reference(*args, top_k=2)
    assert jnp.allclose(out, ref, atol=1e-3, rtol=1e-3), "mismatch (multi tile)"

    print("KERNEL_OK")
</pallas_src>

<mosaic_0001>
module attributes {stable_mosaic.version = 11 : i64} {
  func.func @_moe_kernel(%arg0: i32, %arg1: i32, %arg2: memref<128x128xf32, #tpu.memory_space<vmem>>, %arg3: memref<4x128xf32, #tpu.memory_space<vmem>>, %arg4: memref<1x4xf32, #tpu.memory_space<vmem>>, %arg5: memref<4x128xf32, #tpu.memory_space<vmem>>, %arg6: memref<1x128x128xf32, #tpu.memory_space<vmem>>, %arg7: memref<128x128xf32, #tpu.memory_space<vmem>>, %arg8: memref<128x4xf32, #tpu.memory_space<vmem>>, %arg9: memref<128x128xf32, #tpu.memory_space<vmem>>) attributes {dimension_semantics = [#tpu.dimension_semantics<parallel>, #tpu.dimension_semantics<arbitrary>], iteration_bounds = array<i64: 1, 4>, scalar_prefetch = 0 : i64, scratch_operands = 2 : i64, tpu.core_type = #tpu.core_type<tc>, window_params = [{transform_indices = @transform_0, window_bounds = array<i64: 128, 128>}, {pipeline_mode = #tpu.pipeline_mode<synchronous>, transform_indices = @transform_1, window_bounds = array<i64: 4, 128>}, {pipeline_mode = #tpu.pipeline_mode<synchronous>, transform_indices = @transform_2, window_bounds = array<i64: 1, 4>}, {pipeline_mode = #tpu.pipeline_mode<synchronous>, transform_indices = @transform_3, window_bounds = array<i64: 4, 128>}, {transform_indices = @transform_4, window_bounds = array<i64: 1, 128, 128>}, {transform_indices = @transform_5, window_bounds = array<i64: 128, 128>}]} {
    %c0_i32 = arith.constant 0 : i32
    %0 = arith.cmpi eq, %arg1, %c0_i32 : i32
    %1 = arith.extui %0 : i1 to i32
    %c0_i32_0 = arith.constant 0 : i32
    %2 = arith.cmpi ne, %1, %c0_i32_0 : i32
    scf.if %2 {
      %c0_14 = arith.constant 0 : index
      %c0_15 = arith.constant 0 : index
      %23 = vector.load %arg2[%c0_14, %c0_15] : memref<128x128xf32, #tpu.memory_space<vmem>>, vector<128x128xf32>
      %c0_16 = arith.constant 0 : index
      %c0_17 = arith.constant 0 : index
      %24 = vector.load %arg3[%c0_16, %c0_17] : memref<4x128xf32, #tpu.memory_space<vmem>>, vector<4x128xf32>
      %cst_18 = arith.constant dense<0.000000e+00> : vector<128x4xf32>
      %25 = tpu.matmul %23, %24, %cst_18 {dimension_numbers = #tpu.dot_dimension_numbers<[1], [1], [0], [0], [0, 0, 1, 0], [], []>} : vector<128x128xf32>, vector<4x128xf32>, vector<128x4xf32> -> vector<128x4xf32>
      %c0_19 = arith.constant 0 : index
      %c0_20 = arith.constant 0 : index
      %26 = vector.load %arg4[%c0_19, %c0_20] : memref<1x4xf32, #tpu.memory_space<vmem>>, vector<1x4xf32>
      %27 = vector.broadcast %26 : vector<1x4xf32> to vector<128x4xf32>
      %28 = arith.addf %25, %27 : vector<128x4xf32>
      %cst_21 = arith.constant dense<0xFF800000> : vector<128xf32>
      %29 = vector.multi_reduction <maximumf>, %28, %cst_21 [1] : vector<128x4xf32> to vector<128xf32>
      %30 = vector.shape_cast %29 : vector<128xf32> to vector<128x1xf32>
      %31 = vector.broadcast %30 : vector<128x1xf32> to vector<128x4xf32>
      %32 = arith.subf %28, %31 : vector<128x4xf32>
      %33 = math.exp %32 : vector<128x4xf32>
      %cst_22 = arith.constant dense<0.000000e+00> : vector<128xf32>
      %34 = vector.multi_reduction <add>, %33, %cst_22 [1] : vector<128x4xf32> to vector<128xf32>
      %35 = vector.shape_cast %34 : vector<128xf32> to vector<128x1xf32>
      %36 = tpu.reciprocal %35 : vector<128x1xf32> -> vector<128x1xf32>
      %37 = vector.broadcast %36 : vector<128x1xf32> to vector<128x4xf32>
      %38 = arith.mulf %33, %37 : vector<128x4xf32>
      %39 = tpu.iota {dimensions = array<i32: 1>} : vector<128x4xi32>
      %cst_23 = arith.constant 0.000000e+00 : f32
      %40 = vector.broadcast %cst_23 : f32 to vector<128x4xf32>
      %cst_24 = arith.constant dense<0xFF800000> : vector<128xf32>
      %41 = vector.multi_reduction <maximumf>, %38, %cst_24 [1] : vector<128x4xf32> to vector<128xf32>
      %42 = vector.shape_cast %41 : vector<128xf32> to vector<128x1xf32>
      %43 = vector.broadcast %42 : vector<128x1xf32> to vector<128x4xf32>
      %44 = arith.cmpf oeq, %38, %43 : vector<128x4xf32>
      %c4_i32 = arith.constant 4 : i32
      %45 = vector.broadcast %c4_i32 : i32 to vector<128x4xi32>
      %46 = arith.select %44, %39, %45 : vector<128x4xi1>, vector<128x4xi32>
      %cst_25 = arith.constant dense<2147483647> : vector<128xi32>
      %47 = vector.multi_reduction <minsi>, %46, %cst_25 [1] : vector<128x4xi32> to vector<128xi32>
      %48 = vector.shape_cast %47 : vector<128xi32> to vector<128x1xi32>
      %49 = vector.broadcast %48 : vector<128x1xi32> to vector<128x4xi32>
      %50 = arith.cmpi eq, %39, %49 : vector<128x4xi32>
      %51 = arith.select %50, %38, %40 : vector<128x4xi1>, vector<128x4xf32>
      %cst_26 = arith.constant 0xFF800000 : f32
      %52 = vector.broadcast %cst_26 : f32 to vector<128x4xf32>
      %53 = arith.select %50, %52, %38 : vector<128x4xi1>, vector<128x4xf32>
      %cst_27 = arith.constant dense<0xFF800000> : vector<128xf32>
      %54 = vector.multi_reduction <maximumf>, %53, %cst_27 [1] : vector<128x4xf32> to vector<128xf32>
      %55 = vector.shape_cast %54 : vector<128xf32> to vector<128x1xf32>
      %56 = vector.broadcast %55 : vector<128x1xf32> to vector<128x4xf32>
      %57 = arith.cmpf oeq, %53, %56 : vector<128x4xf32>
      %c4_i32_28 = arith.constant 4 : i32
      %58 = vector.broadcast %c4_i32_28 : i32 to vector<128x4xi32>
      %59 = arith.select %57, %39, %58 : vector<128x4xi1>, vector<128x4xi32>
      %cst_29 = arith.constant dense<2147483647> : vector<128xi32>
      %60 = vector.multi_reduction <minsi>, %59, %cst_29 [1] : vector<128x4xi32> to vector<128xi32>
      %61 = vector.shape_cast %60 : vector<128xi32> to vector<128x1xi32>
      %62 = vector.broadcast %61 : vector<128x1xi32> to vector<128x4xi32>
      %63 = arith.cmpi eq, %39, %62 : vector<128x4xi32>
      %64 = arith.select %63, %53, %51 : vector<128x4xi1>, vector<128x4xf32>
      %c0_30 = arith.constant 0 : index
      %c0_31 = arith.constant 0 : index
      %65 = vector.load %arg8[%c0_30, %c0_31] : memref<128x4xf32, #tpu.memory_space<vmem>>, vector<128x4xf32>
      tpu.vector_store %arg8[%c0_30, %c0_31], %64 {strides = array<i32>} : memref<128x4xf32, #tpu.memory_space<vmem>>, vector<128x4xf32>,
      %c0_32 = arith.constant 0 : index
      %c0_33 = arith.constant 0 : index
      %66 = vector.load %arg5[%c0_32, %c0_33] : memref<4x128xf32, #tpu.memory_space<vmem>>, vector<4x128xf32>
      %cst_34 = arith.constant dense<0.000000e+00> : vector<128x128xf32>
      %67 = tpu.matmul %64, %66, %cst_34 {dimension_numbers = #tpu.dot_dimension_numbers<[1], [0], [0], [1], [0, 0, 1, 1], [], []>} : vector<128x4xf32>, vector<4x128xf32>, vector<128x128xf32> -> vector<128x128xf32>
      %c0_35 = arith.constant 0 : index
      %c0_36 = arith.constant 0 : index
      %68 = vector.load %arg9[%c0_35, %c0_36] : memref<128x128xf32, #tpu.memory_space<vmem>>, vector<128x128xf32>
      tpu.vector_store %arg9[%c0_35, %c0_36], %67 {strides = array<i32>} : memref<128x128xf32, #tpu.memory_space<vmem>>, vector<128x128xf32>,
    } else {
    }
    %3 = tpu.iota {dimensions = array<i32: 1>} : vector<128x4xi32>
    %4 = vector.broadcast %arg1 : i32 to vector<128x4xi32>
    %5 = arith.cmpi eq, %3, %4 : vector<128x4xi32>
    %c0 = arith.constant 0 : index
    %c0_1 = arith.constant 0 : index
    %6 = vector.load %arg8[%c0, %c0_1] : memref<128x4xf32, #tpu.memory_space<vmem>>, vector<128x4xf32>
    %cst = arith.constant 0.000000e+00 : f32
    %7 = vector.broadcast %cst : f32 to vector<128x4xf32>
    %8 = arith.select %5, %6, %7 : vector<128x4xi1>, vector<128x4xf32>
    %cst_2 = arith.constant dense<0.000000e+00> : vector<128xf32>
    %9 = vector.multi_reduction <add>, %8, %cst_2 [1] : vector<128x4xf32> to vector<128xf32>
    %10 = vector.shape_cast %9 : vector<128xf32> to vector<128x1xf32>
    %c0_3 = arith.constant 0 : index
    %c0_4 = arith.constant 0 : index
    %11 = vector.load %arg2[%c0_3, %c0_4] : memref<128x128xf32, #tpu.memory_space<vmem>>, vector<128x128xf32>
    %c0_5 = arith.constant 0 : index
    %c0_6 = arith.constant 0 : index
    %c0_7 = arith.constant 0 : index
    %12 = vector.load %arg6[%c0_5, %c0_6, %c0_7] : memref<1x128x128xf32, #tpu.memory_space<vmem>>, vector<1x128x128xf32>
    %13 = vector.shape_cast %12 : vector<1x128x128xf32> to vector<128x128xf32>
    %cst_8 = arith.constant dense<0.000000e+00> : vector<128x128xf32>
    %14 = tpu.matmul %11, %13, %cst_8 {dimension_numbers = #tpu.dot_dimension_numbers<[1], [1], [0], [0], [0, 0, 1, 0], [], []>} : vector<128x128xf32>, vector<128x128xf32>, vector<128x128xf32> -> vector<128x128xf32>
    %c0_9 = arith.constant 0 : index
    %c0_10 = arith.constant 0 : index
    %15 = vector.load %arg9[%c0_9, %c0_10] : memref<128x128xf32, #tpu.memory_space<vmem>>, vector<128x128xf32>
    %16 = vector.broadcast %10 : vector<128x1xf32> to vector<128x128xf32>
    %17 = arith.mulf %16, %14 : vector<128x128xf32>
    %18 = arith.addf %15, %17 : vector<128x128xf32>
    %c0_11 = arith.constant 0 : index
    %c0_12 = arith.constant 0 : index
    %19 = vector.load %arg9[%c0_11, %c0_12] : memref<128x128xf32, #tpu.memory_space<vmem>>, vector<128x128xf32>
    tpu.vector_store %arg9[%c0_11, %c0_12], %18 {strides = array<i32>} : memref<128x128xf32, #tpu.memory_space<vmem>>, vector<128x128xf32>,
    %c3_i32 = arith.constant 3 : i32
    %20 = arith.cmpi eq, %arg1, %c3_i32 : i32
    %21 = arith.extui %20 : i1 to i32
    %c0_i32_13 = arith.constant 0 : i32
    %22 = arith.cmpi ne, %21, %c0_i32_13 : i32
    scf.if %22 {
      %c0_14 = arith.constant 0 : index
      %c0_15 = arith.constant 0 : index
      %23 = vector.load %arg9[%c0_14, %c0_15] : memref<128x128xf32, #tpu.memory_space<vmem>>, vector<128x128xf32>
      %c0_16 = arith.constant 0 : index
      %c0_17 = arith.constant 0 : index
      %24 = vector.load %arg7[%c0_16, %c0_17] : memref<128x128xf32, #tpu.memory_space<vmem>>, vector<128x128xf32>
      tpu.vector_store %arg7[%c0_16, %c0_17], %23 {strides = array<i32>} : memref<128x128xf32, #tpu.memory_space<vmem>>, vector<128x128xf32>,
    } else {
    }
    return
  }
  func.func @transform_0(%arg0: i32, %arg1: i32) -> (i32, i32) {
    %c0_i32 = arith.constant 0 : i32
    %c0_i32_0 = arith.constant 0 : i32
    return %arg0, %c0_i32 : i32, i32
  }
  func.func @transform_1(%arg0: i32, %arg1: i32) -> (i32, i32) {
    %c0_i32 = arith.constant 0 : i32
    %c0_i32_0 = arith.constant 0 : i32
    %c0_i32_1 = arith.constant 0 : i32
    return %c0_i32, %c0_i32_0 : i32, i32
  }
  func.func @transform_2(%arg0: i32, %arg1: i32) -> (i32, i32) {
    %c0_i32 = arith.constant 0 : i32
    %c0_i32_0 = arith.constant 0 : i32
    %c0_i32_1 = arith.constant 0 : i32
    return %c0_i32, %c0_i32_0 : i32, i32
  }
  func.func @transform_3(%arg0: i32, %arg1: i32) -> (i32, i32) {
    %c0_i32 = arith.constant 0 : i32
    %c0_i32_0 = arith.constant 0 : i32
    %c0_i32_1 = arith.constant 0 : i32
    return %c0_i32, %c0_i32_0 : i32, i32
  }
  func.func @transform_4(%arg0: i32, %arg1: i32) -> (i32, i32, i32) {
    %c0_i32 = arith.constant 0 : i32
    %c0_i32_0 = arith.constant 0 : i32
    %c0_i32_1 = arith.constant 0 : i32
    return %arg1, %c0_i32, %c0_i32_0 : i32, i32, i32
  }
  func.func @transform_5(%arg0: i32, %arg1: i32) -> (i32, i32) {
    %c0_i32 = arith.constant 0 : i32
    %c0_i32_0 = arith.constant 0 : i32
    return %arg0, %c0_i32 : i32, i32
  }
}

</mosaic_0001>

<bundles_post_ra>
// kernel: tpu_custom_call.1
= control target key start
LH: loop header
LB: loop body
LE: loop exit
PB: predicated region body
PF: predicated region fallthrough
CT: control target
= control target key end

     0   :  { %10 = vsyncpa [#allocation5], 0  ;;  %s3989_s0 = inlined_call_operand.hbm [shape: f32[128,128], index: 0, kind: input, shape index: {}]   ;;  %s3990_s1 = inlined_call_operand.hbm [shape: f32[4,128], index: 1, kind: input, shape index: {}]   ;;  %s3991_s2 = inlined_call_operand.vmem [shape: f32[1,4], index: 2, kind: input, shape index: {}]   ;;  %s3992_s3 = inlined_call_operand.vmem [shape: f32[4,128], index: 3, kind: input, shape index: {}]   ;;  %s3993_s4 = inlined_call_operand.hbm [shape: f32[4,128,128], index: 4, kind: input, shape index: {}]   ;;  %s3994_s5 = inlined_call_operand.hbm [shape: f32[128,128], index: 5, kind: output, shape index: {}]  }
   0x1   :  { %11 = vsyncpa [#allocation8], 0 }
   0x2   :  { %12 = vsyncpa [#allocation6], 0  ;;  %s2665_s18 = smov 0   ;;  %s2667_s19 = smov 0  }
   0x3   :  { %s2669_s20 = smov 0   ;;  %s2671_s21 = smov 0  }
   0x4   :  { %s2673_s22 = smov 0   ;;  %s2675_s23 = smov 0  }
   0x5 LB: > { %s2694_s24 = sadd.s32 4294967295, %s2625_s23   ;;  %p133_p0 = scmp.ne.s32.totalorder %s2613_s20, %s2609_s19  ;;  %s2625_s23 = sphi %s2675_s23, %s18_s23   ;;  %s2621_s22 = sphi %s2673_s22, %s4109_s22   ;;  %s2617_s21 = sphi %s2671_s21, %s4108_s21   ;;  %s2613_s20 = sphi %s2669_s20, %s4107_s20   ;;  %s2609_s19 = sphi %s2667_s19, %s4106_s19   ;;  %s2605_s18 = sphi %s2665_s18, %s4105_s18  }
   0x6   : > { %p134_p1 = scmp.eq.s32.totalorder %s2625_s23, 0  ;;  %p139_p2 = scmp.ne.s32.totalorder %s2609_s19, %s2605_s18 }
   0x7   : > { %p3995_p3 = scmp.eq.s32.totalorder %s2694_s24, 0  ;;  %p2042_p4 = scmp.ge.s32.totalorder %s2625_s23, 1 }
   0x8   : > { %p135_p5 = por %p134_p1, %p133_p0  ;;  %p176_p6 = scmp.lt.s32.totalorder %s2625_s23, 5 }
   0x9   : > { %p2705_p7 = por %p3995_p3, %p139_p2  ;;  %s2627_s27 = smov [#allocation4]  }
   0xa   : > { %p2709_p8 = pnand %p2042_p4, %p176_p6  ;;  %s191_s28 = sshll.u32 %s2627_s27, 4  ;;  %s192_s28 = int_to_ptr.vmem [resolvable:$true] %s191_s28 }
   0xb   : > { %s4032_s25 = scalar_select %p2705_p7, 1, 0 }
   0xc   : > { %s4033_s26 = scalar_select %p2709_p8, 1, 0 }
   0xd   : > { %p2314_p9 = pneg %p2709_p8  ;;  %p2327_p11 = scmp.lt.s32.totalorder %s2625_s23, 4 }
   0xe   : > { %s2451_s8 = scalar_lea.hbm %s3989_s0, 2048 }
   0xf   : > { %p2717_p10 = pnand %p2314_p9, %p3995_p3  ;;  %p2722_p12 = pnand %p2327_p11, %p135_p5 }
  0x10   : > { %p2452_p13 = scmp.ne.s32.totalorder %s3989_s0, %s2451_s8  ;;  %p2458_p4 = scmp.lt.u32.totalorder %s2451_s8, %s3989_s0 }
  0x11   : > { %s4035_s30 = scalar_select %p2722_p12, 1, 0 }
  0x12   : > { %p2453_p0 = pneg %p2717_p10 }
  0x14   : > { %p2454_p1 = pnand %p2453_p0, %p2452_p13 }
  0x16   : > { %p2455_p2 = pneg %p2454_p1 }
  0x18   : > { %p2460_p5 = pnand %p2458_p4, %p2455_p2 }
  0x1a   : > { %2463 = shalt.err (!%p2460_p5)
}
  0x1b   : > { %s2464_s13 = scalar_lea.vmem %s192_s28, 2048  ;;  %p2472_p3 = scmp.lt.s32.totalorder %s192_s28, %s192_s28 }
  0x1c   : > { %p2465_p6 = scmp.ne.s32.totalorder %s192_s28, %s2464_s13  ;;  %p2473_p7 = scmp.lt.s32.totalorder %s2464_s13, %s2464_s13 }
  0x1e   : > { %p2467_p9 = pnand %p2465_p6, %p2453_p0  ;;  %p2474_p8 = por %p2473_p7, %p2472_p3 }
  0x20   : > { %p2468_p11 = pneg %p2467_p9 }
  0x22   : > { %p2475_p12 = pnand %p2474_p8, %p2468_p11 }
  0x24   : > { %2478 = shalt.err (!%p2475_p12)
}
  0x25   : > { %s2628_s14 = smov 128   ;;  %s2629_s15 = smov 8  }
  0x26   : > { %2317 = dma.hbm_to_vmem [thread:$0]  (!%p2717_p10), %s3989_s0, 2048, %s192_s28, [#allocation5], %s2628_s14, %s2628_s14, %s2629_s15  }
  0x27   : > { %s2630_s18 = smov [#allocation7]   ;;  %s2479_s8 = scalar_lea.hbm %s3990_s1, 64 }
  0x28   : > { %s205_s27 = sshll.u32 %s2630_s18, 4  ;;  %p2480_p3 = scmp.ne.s32.totalorder %s3990_s1, %s2479_s8  ;;  %s206_s27 = int_to_ptr.vmem [resolvable:$true] %s205_s27 }
  0x29   : > { %p2486_p12 = scmp.lt.u32.totalorder %s2479_s8, %s3990_s1 }
  0x2a   : > { %p2482_p7 = pnand %p2480_p3, %p2453_p0 }
  0x2c   : > { %p2483_p8 = pneg %p2482_p7 }
  0x2e   : > { %p2488_p13 = pnand %p2486_p12, %p2483_p8 }
  0x30   : > { %2491 = shalt.err (!%p2488_p13)
}
  0x31   : > { %s2492_s28 = scalar_lea.vmem %s206_s27, 64  ;;  %p2500_p5 = scmp.lt.s32.totalorder %s206_s27, %s206_s27 }
  0x32   : > { %p2493_p1 = scmp.ne.s32.totalorder %s206_s27, %s2492_s28  ;;  %p2501_p6 = scmp.lt.s32.totalorder %s2492_s28, %s2492_s28 }
  0x34   : > { %p2495_p2 = pnand %p2493_p1, %p2453_p0  ;;  %p2502_p9 = por %p2501_p6, %p2500_p5 }
  0x36   : > { %p2496_p4 = pneg %p2495_p2 }
  0x38   : > { %p2503_p11 = pnand %p2502_p9, %p2496_p4 }
  0x3a   : > { %2506 = shalt.err (!%p2503_p11)
}
  0x3b   : > { %2320 = dma.hbm_to_vmem [thread:$0]  (!%p2717_p10), %s3990_s1, 64, %s206_s27, [#allocation8]  }
  0x3c   : > { %s27_s17 = sadd.s32 1, %s2621_s22  ;;  %s126_s18 = sadd.s32 1, %s2613_s20 }
  0x3d   : > { %p28_p0 = scmp.ge.s32.totalorder %s27_s17, 4  ;;  %s222_s6 = sand.u32 1, %s2625_s23  }
  0x3e   : > { %s224_s7 = sand.u32 1, %s2613_s20   ;;  %s2077_s8 = sshll.u32 %s2621_s22, 11 }
  0x3f   : > { %s4111_s17 = smov (%p28_p0, %s27_s17), 0  ;;  %s2046_s29 = sshll.u32 %s224_s7, 7 }
  0x40   : > { %s123_s9 = ssub.s32 %s2621_s22, %s4111_s17  ;;  %s2783_s12 = scalar_lea.hbm %s3993_s4, %s2077_s8 }
  0x41   : > { %p124_p3 = scmp.eq.s32.totalorder %s123_s9, 0  ;;  %s226_s27 = scalar_lea.vmem [#allocation9], %s2046_s29 }
  0x42   : > { %s233_s28 = sshll.u32 %s226_s27, 4  ;;  %s2790_s16 = scalar_lea.sflag [#allocation5], %s222_s6  ;;  %s2788_s28 = int_to_ptr.vmem [resolvable:$true] %s233_s28 }
  0x43   : > { %s2786_s13 = scalar_select %p124_p3, %s2613_s20, %s126_s18  }
  0x44   : > { %s2507_s7 = scalar_lea.hbm %s2783_s12, 2048  ;;  %p4036_p7 = scmp.ne.s32.totalorder %s4035_s30, 0 }
  0x45   : > { %p2508_p10 = scmp.ne.s32.totalorder %s2783_s12, %s2507_s7  ;;  %s2512_s10 = scalar_lea.hbm %s3993_s4, 8192 }
  0x46   : > { %p2509_p8 = pneg %p4036_p7  ;;  %p2513_p1 = scmp.lt.u32.totalorder %s2783_s12, %s3993_s4 }
  0x47   : > { %p2514_p2 = scmp.lt.u32.totalorder %s2512_s10, %s2507_s7  ;;  %p2516_p5 = scmp.lt.u32.totalorder %s2507_s7, %s2783_s12 }
  0x48   : > { %p2510_p12 = pnand %p2509_p8, %p2508_p10 }
  0x49   : > { %p2515_p4 = por %p2514_p2, %p2513_p1 }
  0x4a   : > { %p2511_p13 = pneg %p2510_p12 }
  0x4b   : > { %p2517_p6 = por %p2516_p5, %p2515_p4 }
  0x4d   : > { %p2518_p9 = pnand %p2517_p6, %p2511_p13 }
  0x4f   : > { %2521 = shalt.err (!%p2518_p9)
}
  0x50   : > { %s2522_s18 = scalar_lea.vmem %s2788_s28, 2048  ;;  %s2631_s6 = smov [#allocation9]  }
  0x51   : > { %p2523_p11 = scmp.ne.s32.totalorder %s2788_s28, %s2522_s18  ;;  %s2527_s27 = sshll.u32 %s2631_s6, 4  ;;  %s2528_s27 = int_to_ptr.vmem [resolvable:$false] %s2527_s27 }
  0x52   : > { %s2529_s8 = scalar_lea.vmem %s2528_s27, 4096  ;;  %p2530_p10 = scmp.lt.s32.totalorder %s2788_s28, %s2528_s27 }
  0x53   : > { %p2525_p0 = pnand %p2523_p11, %p2509_p8  ;;  %p2531_p12 = scmp.lt.s32.totalorder %s2529_s8, %s2522_s18 }
  0x55   : > { %p2526_p3 = pneg %p2525_p0  ;;  %p2532_p1 = por %p2531_p12, %p2530_p10 }
  0x57   : > { %p2533_p2 = pnand %p2532_p1, %p2526_p3 }
  0x59   : > { %2536 = shalt.err (!%p2533_p2)
}
  0x5a   : > { %2324 = dma.hbm_to_vmem [thread:$0]  (!%p4036_p7), %s2783_s12, 2048, %s2788_s28, %s2790_s16, %s2628_s14, %s2628_s14, %s2629_s15  }
  0x5b   : > { %p4037_p8 = scmp.ne.s32.totalorder %s4033_s26, 0 }
  0x5c   : > { %p4038_p13 = scmp.eq.s32.totalorder (!%p4037_p8), %s2694_s24, 0 }
  0x5d   : > { %245 = sbr.rel (%p4037_p8) target bundleno = 2116 (0x844), region = 40 }
  0x64   : > { %2588 = dma.done.wait (%p4038_p13), [#allocation5], 2048   ;;  %p4039_p4 = pmov %p4038_p13 }
  0x66   : > { %2590 = vsyncadd (%p4039_p4), [#allocation5], 4294965248  ;;  %p4040_p5 = pmov %p4039_p4 }
  0x67   : > { %p4041_p6 = pmov %p4039_p4 }
  0x68   : > { %2592 = dma.done.wait (%p4040_p5), [#allocation8], 64  }
  0x69   : > { %2594 = vsyncadd (%p4041_p6), [#allocation8], 4294967232  ;;  %s255_s30 = sand.u32 1, %s2694_s24   ;;  %s257_s14 = sand.u32 1, %s2609_s19  }
  0x6a   : > { %s2052_s15 = sshll.u32 %s257_s14, 7  ;;  %s256_s26 = scalar_lea.sflag [#allocation5], %s255_s30 }
  0x6b   : > { %s2833_s12 = scalar_lea.vmem [#allocation9], %s2052_s15  ;;  %p4042_p7 = scmp.ne.s32.totalorder %s4032_s25, 0 }
  0x6d   : > { %2596 = dma.done.wait (%p4042_p7), %s256_s26, 2048  }
  0x6e   : > { %2598 = vsyncadd (%p4042_p7), %s256_s26, 4294965248  ;;  %p2053_p9 = scmp.ne.s32.totalorder %s2617_s21, 0 }
  0x70   : > { %286 = sbr.rel (%p2053_p9) target bundleno = 1784 (0x6f8), region = 56 }
  0x77   : > { %v303_v0 = vld [vmem:[#allocation7] sm:$0xf]  ;;  %v288_v2 = vld [vmem:[#allocation4 + $0x8] sm:$0xff]  ;;  %v289_v3 = vld [vmem:[#allocation4 + $0x10] sm:$0xff]  ;;  %vm456_vm0 = vcmask 31744  }
  0x78   : > { %v287_v1 = vld [vmem:[#allocation4] sm:$0xff]  ;;  %2144 = vmatprep.subr.mxu0 %v303_v0  ;;  %v290_v4 = vld [vmem:[#allocation4 + $0x18] sm:$0xff]  ;;  %v292_v6 = vld [vmem:[#allocation4 + $0x28] sm:$0xff] }
  0x79   : > { %2146 = vmatprep.mubr.f32.mxu0 %v287_v1  ;;  %2145 = vmatpush3.xpose.msra.mxu0 %v303_v0  ;;  %v291_v5 = vld [vmem:[#allocation4 + $0x20] sm:$0xff]  ;;  %v293_v7 = vld [vmem:[#allocation4 + $0x30] sm:$0xff]  ;;  %v294_v8 = vld [vmem:[#allocation4 + $0x38] sm:$0xff] }
  0x7a   : > { %v295_v9 = vld [vmem:[#allocation4 + $0x40] sm:$0xff]  ;;  %v296_v10 = vld [vmem:[#allocation4 + $0x48] sm:$0xff]  ;;  %v297_v11 = vld [vmem:[#allocation4 + $0x50] sm:$0xff] }
  0x7b   : > { %v298_v12 = vld [vmem:[#allocation4 + $0x58] sm:$0xff]  ;;  %v299_v13 = vld [vmem:[#allocation4 + $0x60] sm:$0xff]  ;;  %v300_v14 = vld [vmem:[#allocation4 + $0x68] sm:$0xff] }
  0x7c   : > { %2147 = vmatmul.mubr.f32.vlgmr.msra.gmra.mrb[0].mxu0 %v288_v2  ;;  %v301_v15 = vld [vmem:[#allocation4 + $0x70] sm:$0xff]  ;;  %v302_v16 = vld [vmem:[#allocation4 + $0x78] sm:$0xff]  ;;  %v2054_v17 = vld [vmem:[%s3991_s2] ss:$0 sm:$0xff] }
  0x7d   : > { %2149 = vmatprep.mubr.f32.mxu0 %v289_v3 }
  0x80   : > { %2150 = vmatmul.mubr.f32.gmra.mrb[2].mxu0 %v290_v4 }
  0x81   : > { %2152 = vmatprep.mubr.f32.mxu0 %v291_v5 }
  0x84   : > { %2153 = vmatmul.mubr.f32.gmra.mrb[4].mxu0 %v292_v6 }
  0x85   : > { %2155 = vmatprep.mubr.f32.mxu0 %v293_v7 }
  0x88   : > { %2156 = vmatmul.mubr.f32.gmra.mrb[6].mxu0 %v294_v8 }
  0x89   : > { %2158 = vmatprep.mubr.f32.mxu0 %v295_v9 }
  0x8c   : > { %2159 = vmatmul.mubr.f32.gmra.mrb[8].mxu0 %v296_v10 }
  0x8d   : > { %2161 = vmatprep.mubr.f32.mxu0 %v297_v11 }
  0x90   : > { %2162 = vmatmul.mubr.f32.gmra.mrb[10].mxu0 %v298_v12 }
  0x91   : > { %2164 = vmatprep.mubr.f32.mxu0 %v299_v13 }
  0x94   : > { %2165 = vmatmul.mubr.f32.gmra.mrb[12].mxu0 %v300_v14 }
  0x95   : > { %2167 = vmatprep.mubr.f32.mxu0 %v301_v15 }
  0x98   : > { %2168 = vmatmul.mubr.f32.gmra.mrb[14].mxu0 %v302_v16 }
 0x14f   : > { %v2148_v18 = vpop.f32.mrb[0].mxu0 }
 0x150   : > { %v377_v19 = vpop.f32.mrb[1].mxu0  ;;  %v2845_v21 = vadd.f32 %v2148_v18, %v2054_v17 }
 0x151   : > { %v2843_v20 = vadd.f32 %v2054_v17, %v377_v19 }
 0x152   : > { %v460_v29 = vsel %vm456_vm0, %v2845_v21, -inf }
 0x153   : > { %v2151_v22 = vpop.f32.mrb[2].mxu0  ;;  %v457_v23 = vsel %vm456_vm0, %v2843_v20, -inf }
 0x154   : > { %v387_v24 = vpop.f32.mrb[3].mxu0  ;;  %458 = vmax.xlane.f32.xlu0 %v457_v23  ;;  %v2851_v26 = vadd.f32 %v2151_v22, %v2054_v17 }
 0x155   : > { %v2849_v25 = vadd.f32 %v2054_v17, %v387_v24 }
 0x156   : > { %v466_v34 = vsel %vm456_vm0, %v2851_v26, -inf }
 0x157   : > { %v2154_v27 = vpop.f32.mrb[4].mxu0  ;;  %v463_v28 = vsel %vm456_vm0, %v2849_v25, -inf }
 0x158   : > { %v397_v30 = vpop.f32.mrb[5].mxu0  ;;  %464 = vmax.xlane.f32.xlu1 %v463_v28  ;;  %461 = vmax.xlane.f32.xlu0 %v460_v29  ;;  %v2859_v32 = vadd.f32 %v2154_v27, %v2054_v17 }
 0x159   : > { %v2857_v31 = vadd.f32 %v2054_v17, %v397_v30 }
 0x15a   : > { %v472_v40 = vsel %vm456_vm0, %v2859_v32, -inf }
 0x15b   : > { %v2157_v33 = vpop.f32.mrb[6].mxu0  ;;  %v469_v35 = vsel %vm456_vm0, %v2857_v31, -inf }
 0x15c   : > { %v407_v36 = vpop.f32.mrb[7].mxu0  ;;  %467 = vmax.xlane.f32.xlu1 %v466_v34  ;;  %470 = vmax.xlane.f32.xlu0 %v469_v35  ;;  %v2867_v38 = vadd.f32 %v2157_v33, %v2054_v17 }
 0x15d   : > { %v2865_v37 = vadd.f32 %v2054_v17, %v407_v36 }
 0x15e   : > { %v478_v46 = vsel %vm456_vm0, %v2867_v38, -inf }
 0x15f   : > { %v2160_v39 = vpop.f32.mrb[8].mxu0  ;;  %v475_v41 = vsel %vm456_vm0, %v2865_v37, -inf }
 0x160   : > { %v417_v42 = vpop.f32.mrb[9].mxu0  ;;  %473 = vmax.xlane.f32.xlu1 %v472_v40  ;;  %476 = vmax.xlane.f32.xlu0 %v475_v41  ;;  %v2875_v44 = vadd.f32 %v2160_v39, %v2054_v17 }
 0x161   : > { %v2873_v43 = vadd.f32 %v2054_v17, %v417_v42 }
 0x162   : > { %v484_v52 = vsel %vm456_vm0, %v2875_v44, -inf }
 0x163   : > { %v2163_v45 = vpop.f32.mrb[10].mxu0  ;;  %v481_v47 = vsel %vm456_vm0, %v2873_v43, -inf }
 0x164   : > { %v427_v48 = vpop.f32.mrb[11].mxu0  ;;  %479 = vmax.xlane.f32.xlu1 %v478_v46  ;;  %482 = vmax.xlane.f32.xlu0 %v481_v47  ;;  %v2883_v50 = vadd.f32 %v2163_v45, %v2054_v17 }
 0x165   : > { %v2881_v49 = vadd.f32 %v2054_v17, %v427_v48 }
 0x166   : > { %v490_v58 = vsel %vm456_vm0, %v2883_v50, -inf }
 0x167   : > { %v2166_v51 = vpop.f32.mrb[12].mxu0  ;;  %v487_v53 = vsel %vm456_vm0, %v2881_v49, -inf }
 0x168   : > { %v437_v54 = vpop.f32.mrb[13].mxu0  ;;  %485 = vmax.xlane.f32.xlu1 %v484_v52  ;;  %488 = vmax.xlane.f32.xlu0 %v487_v53  ;;  %v2891_v56 = vadd.f32 %v2166_v51, %v2054_v17 }
 0x169   : > { %v2889_v55 = vadd.f32 %v2054_v17, %v437_v54 }
 0x16a   : > { %v496_v63 = vsel %vm456_vm0, %v2891_v56, -inf }
 0x16b   : > { %v2169_v57 = vpop.f32.mrb[14].mxu0  ;;  %v493_v59 = vsel %vm456_vm0, %v2889_v55, -inf }
 0x16c   : > { %v447_v60 = vpop.f32.mrb[15].mxu0  ;;  %491 = vmax.xlane.f32.xlu1 %v490_v58  ;;  %494 = vmax.xlane.f32.xlu0 %v493_v59  ;;  %v2899_v62 = vadd.f32 %v2169_v57, %v2054_v17 }
 0x16d   : > { %v2897_v61 = vadd.f32 %v2054_v17, %v447_v60 }
 0x16e   : > { %v502_v1 = vsel %vm456_vm0, %v2899_v62, -inf }
 0x16f   : > { %v499_v0 = vsel %vm456_vm0, %v2897_v61, -inf }
 0x170   : > { %497 = vmax.xlane.f32.xlu1 %v496_v63  ;;  %500 = vmax.xlane.f32.xlu0 %v499_v0 }
 0x174   : > { %503 = vmax.xlane.f32.xlu1 %v502_v1 }
 0x1e1   : > { %v459_v2 = vpop.xlane.xlu0 %458 }
 0x1e2   : > { %v505_v3 = vsub.f32 %v2843_v20, %v459_v2 }
 0x1e4   : > { %v521_v4 = vmul.f32 1.442695, %v505_v3 }
 0x1e5   : > { %v465_v5 = vpop.xlane.xlu1 %464  ;;  %v462_v6 = vpop.xlane.xlu0 %461 }
 0x1e6   : > { %2387 = vpow2.f32 %v521_v4  ;;  %v507_v7 = vsub.f32 %v2849_v25, %v465_v5  ;;  %v506_v8 = vsub.f32 %v2845_v21, %v462_v6 }
 0x1e8   : > { %v525_v9 = vmul.f32 1.442695, %v507_v7  ;;  %v523_v10 = vmul.f32 1.442695, %v506_v8 }
 0x1e9   : > { %v468_v11 = vpop.xlane.xlu1 %467  ;;  %v471_v12 = vpop.xlane.xlu0 %470 }
 0x1ea   : > { %2389 = vpow2.f32 %v525_v9  ;;  %v508_v13 = vsub.f32 %v2851_v26, %v468_v11  ;;  %v509_v14 = vsub.f32 %v2857_v31, %v471_v12 }
 0x1eb   : > { %2391 = vpow2.f32 %v523_v10 }
 0x1ec   : > { %v527_v15 = vmul.f32 1.442695, %v508_v13  ;;  %v529_v16 = vmul.f32 1.442695, %v509_v14 }
 0x1ed   : > { %v474_v17 = vpop.xlane.xlu1 %473  ;;  %v477_v18 = vpop.xlane.xlu0 %476 }
 0x1ee   : > { %2393 = vpow2.f32 %v527_v15  ;;  %v510_v19 = vsub.f32 %v2859_v32, %v474_v17  ;;  %v511_v20 = vsub.f32 %v2865_v37, %v477_v18 }
 0x1ef   : > { %2395 = vpow2.f32 %v529_v16 }
 0x1f0   : > { %v2914_v21 = vpop.eup %2387  ;;  %v531_v22 = vmul.f32 1.442695, %v510_v19  ;;  %v533_v23 = vmul.f32 1.442695, %v511_v20 }
 0x1f1   : > { %v480_v24 = vpop.xlane.xlu1 %479  ;;  %v483_v25 = vpop.xlane.xlu0 %482  ;;  %v553_v26 = vsel %vm456_vm0, %v2914_v21, 0.0 }
 0x1f2   : > { %2397 = vpow2.f32 %v531_v22  ;;  %v512_v27 = vsub.f32 %v2867_v38, %v480_v24  ;;  %v513_v28 = vsub.f32 %v2873_v43, %v483_v25  ;;  %554 = vadd.xlane.f32.xlu0 %v553_v26 }
 0x1f3   : > { %2399 = vpow2.f32 %v533_v23 }
 0x1f4   : > { %v2920_v29 = vpop.eup %2389  ;;  %v535_v30 = vmul.f32 1.442695, %v512_v27  ;;  %v537_v31 = vmul.f32 1.442695, %v513_v28 }
 0x1f5   : > { %v2922_v32 = vpop.eup %2391  ;;  %v486_v33 = vpop.xlane.xlu1 %485  ;;  %v559_v35 = vsel %vm456_vm0, %v2920_v29, 0.0 }
 0x1f6   : > { %v489_v34 = vpop.xlane.xlu0 %488  ;;  %2401 = vpow2.f32 %v535_v30  ;;  %v514_v36 = vsub.f32 %v2875_v44, %v486_v33  ;;  %560 = vadd.xlane.f32.xlu0 %v559_v35  ;;  %v556_v38 = vsel %vm456_vm0, %v2922_v32, 0.0 }
 0x1f7   : > { %v515_v37 = vsub.f32 %v2881_v49, %v489_v34  ;;  %2403 = vpow2.f32 %v537_v31  ;;  %557 = vadd.xlane.f32.xlu1 %v556_v38 }
 0x1f8   : > { %v2930_v39 = vpop.eup %2393  ;;  %v539_v40 = vmul.f32 1.442695, %v514_v36 }
 0x1f9   : > { %v541_v41 = vmul.f32 1.442695, %v515_v37  ;;  %v2932_v42 = vpop.eup %2395  ;;  %v492_v43 = vpop.xlane.xlu1 %491  ;;  %v562_v46 = vsel %vm456_vm0, %v2930_v39, 0.0 }
 0x1fa   : > { %v495_v45 = vpop.xlane.xlu0 %494  ;;  %2405 = vpow2.f32 %v539_v40  ;;  %v516_v44 = vsub.f32 %v2883_v50, %v492_v43  ;;  %v565_v48 = vsel %vm456_vm0, %v2932_v42, 0.0 }
 0x1fb   : > { %v517_v47 = vsub.f32 %v2889_v55, %v495_v45  ;;  %2407 = vpow2.f32 %v541_v41  ;;  %563 = vadd.xlane.f32.xlu1 %v562_v46  ;;  %566 = vadd.xlane.f32.xlu0 %v565_v48 }
 0x1fc   : > { %v2940_v49 = vpop.eup %2397  ;;  %v543_v51 = vmul.f32 1.442695, %v516_v44 }
 0x1fd   : > { %v545_v52 = vmul.f32 1.442695, %v517_v47  ;;  %v2942_v53 = vpop.eup %2399  ;;  %v498_v54 = vpop.xlane.xlu1 %497  ;;  %v568_v58 = vsel %vm456_vm0, %v2940_v49, 0.0 }
 0x1fe   : > { %v501_v57 = vpop.xlane.xlu0 %500  ;;  %2409 = vpow2.f32 %v543_v51  ;;  %v518_v50 = vsub.f32 %v2891_v56, %v498_v54  ;;  %v571_v59 = vsel %vm456_vm0, %v2942_v53, 0.0 }
 0x1ff   : > { %v519_v55 = vsub.f32 %v2897_v61, %v501_v57  ;;  %2411 = vpow2.f32 %v545_v52  ;;  %569 = vadd.xlane.f32.xlu1 %v568_v58  ;;  %572 = vadd.xlane.f32.xlu0 %v571_v59 }
 0x200   : > { %v2950_v60 = vpop.eup %2401  ;;  %v547_v63 = vmul.f32 1.442695, %v518_v50 }
 0x201   : > { %v549_v0 = vmul.f32 1.442695, %v519_v55  ;;  %v2952_v1 = vpop.eup %2403  ;;  %v504_v2 = vpop.xlane.xlu1 %503  ;;  %v574_v3 = vsel %vm456_vm0, %v2950_v60, 0.0 }
 0x202   : > { %2413 = vpow2.f32 %v547_v63  ;;  %v520_v56 = vsub.f32 %v2899_v62, %v504_v2  ;;  %v577_v61 = vsel %vm456_vm0, %v2952_v1, 0.0 }
 0x203   : > { %2415 = vpow2.f32 %v549_v0  ;;  %575 = vadd.xlane.f32.xlu1 %v574_v3  ;;  %578 = vadd.xlane.f32.xlu0 %v577_v61 }
 0x204   : > { %v2959_v4 = vpop.eup %2405  ;;  %v551_v5 = vmul.f32 1.442695, %v520_v56 }
 0x205   : > { %v2961_v6 = vpop.eup %2407  ;;  %v580_v7 = vsel %vm456_vm0, %v2959_v4, 0.0 }
 0x206   : > { %2417 = vpow2.f32 %v551_v5  ;;  %v583_v8 = vsel %vm456_vm0, %v2961_v6, 0.0 }
 0x207   : > { %581 = vadd.xlane.f32.xlu1 %v580_v7  ;;  %584 = vadd.xlane.f32.xlu0 %v583_v8 }
 0x208   : > { %v2967_v62 = vpop.eup %2409 }
 0x209   : > { %v2969_v9 = vpop.eup %2411  ;;  %v586_v10 = vsel %vm456_vm0, %v2967_v62, 0.0 }
 0x20a   : > { %v589_v11 = vsel %vm456_vm0, %v2969_v9, 0.0 }
 0x20b   : > { %587 = vadd.xlane.f32.xlu1 %v586_v10  ;;  %590 = vadd.xlane.f32.xlu0 %v589_v11 }
 0x20c   : > { %v2975_v12 = vpop.eup %2413 }
 0x20d   : > { %v2977_v13 = vpop.eup %2415  ;;  %v592_v14 = vsel %vm456_vm0, %v2975_v12, 0.0 }
 0x20e   : > { %v595_v15 = vsel %vm456_vm0, %v2977_v13, 0.0 }
 0x20f   : > { %593 = vadd.xlane.f32.xlu1 %v592_v14  ;;  %596 = vadd.xlane.f32.xlu0 %v595_v15 }
 0x210   : > { %v2983_v16 = vpop.eup %2417 }
 0x211   : > { %v598_v17 = vsel %vm456_vm0, %v2983_v16, 0.0 }
 0x213   : > { %599 = vadd.xlane.f32.xlu1 %v598_v17 }
 0x27f   : > { %v555_v18 = vpop.xlane.xlu0 %554 }
 0x280   : > { %2419 = vrcp.f32 %v555_v18 }
 0x283   : > { %v561_v19 = vpop.xlane.xlu0 %560 }
 0x284   : > { %v558_v20 = vpop.xlane.xlu1 %557  ;;  %2421 = vrcp.f32 %v561_v19 }
 0x285   : > { %2423 = vrcp.f32 %v558_v20 }
 0x288   : > { %v564_v22 = vpop.xlane.xlu1 %563  ;;  %v567_v23 = vpop.xlane.xlu0 %566 }
 0x289   : > { %2425 = vrcp.f32 %v564_v22 }
 0x28a   : > { %v2420_v24 = vpop.eup %2419  ;;  %2427 = vrcp.f32 %v567_v23 }
 0x28b   : > { %v2988_v25 = vmul.f32 %v2420_v24, %v2914_v21 }
 0x28c   : > { %v570_v26 = vpop.xlane.xlu1 %569  ;;  %v573_v27 = vpop.xlane.xlu0 %572 }
 0x28d   : > { %2429 = vrcp.f32 %v570_v26  ;;  %v635_v28 = vsel %vm456_vm0, %v2988_v25, -inf }
 0x28e   : > { %v2422_v30 = vpop.eup %2421  ;;  %2431 = vrcp.f32 %v573_v27  ;;  %636 = vmax.xlane.f32.xlu0 %v635_v28 }
 0x28f   : > { %v2424_v31 = vpop.eup %2423  ;;  %v2993_v33 = vmul.f32 %v2422_v30, %v2920_v29 }
 0x290   : > { %v576_v34 = vpop.xlane.xlu1 %575  ;;  %v579_v35 = vpop.xlane.xlu0 %578  ;;  %v2996_v36 = vmul.f32 %v2424_v31, %v2922_v32 }
 0x291   : > { %2433 = vrcp.f32 %v576_v34  ;;  %v641_v21 = vsel %vm456_vm0, %v2993_v33, -inf }
 0x292   : > { %2435 = vrcp.f32 %v579_v35  ;;  %v638_v37 = vsel %vm456_vm0, %v2996_v36, -inf  ;;  %642 = vmax.xlane.f32.xlu0 %v641_v21 }
 0x293   : > { %v2426_v38 = vpop.eup %2425  ;;  %639 = vmax.xlane.f32.xlu1 %v638_v37 }
 0x294   : > { %v2428_v40 = vpop.eup %2427  ;;  %v582_v41 = vpop.xlane.xlu1 %581  ;;  %v3003_v43 = vmul.f32 %v2426_v38, %v2930_v39 }
 0x295   : > { %v585_v29 = vpop.xlane.xlu0 %584  ;;  %2437 = vrcp.f32 %v582_v41  ;;  %v3006_v32 = vmul.f32 %v2428_v40, %v2932_v42 }
 0x296   : > { %2439 = vrcp.f32 %v585_v29  ;;  %v644_v45 = vsel %vm456_vm0, %v3003_v43, -inf }
 0x297   : > { %v2430_v46 = vpop.eup %2429  ;;  %645 = vmax.xlane.f32.xlu1 %v644_v45  ;;  %v647_v44 = vsel %vm456_vm0, %v3006_v32, -inf }
 0x298   : > { %v2432_v47 = vpop.eup %2431  ;;  %648 = vmax.xlane.f32.xlu0 %v647_v44  ;;  %v588_v48 = vpop.xlane.xlu1 %587  ;;  %v3013_v39 = vmul.f32 %v2430_v46, %v2940_v49 }
 0x299   : > { %v591_v51 = vpop.xlane.xlu0 %590  ;;  %2441 = vrcp.f32 %v588_v48  ;;  %v3016_v42 = vmul.f32 %v2432_v47, %v2942_v53 }
 0x29a   : > { %2443 = vrcp.f32 %v591_v51  ;;  %v650_v52 = vsel %vm456_vm0, %v3013_v39, -inf }
 0x29b   : > { %v2434_v54 = vpop.eup %2433  ;;  %651 = vmax.xlane.f32.xlu1 %v650_v52  ;;  %v653_v57 = vsel %vm456_vm0, %v3016_v42, -inf }
 0x29c   : > { %v2436_v58 = vpop.eup %2435  ;;  %654 = vmax.xlane.f32.xlu0 %v653_v57  ;;  %v594_v50 = vpop.xlane.xlu1 %593  ;;  %v3023_v49 = vmul.f32 %v2434_v54, %v2950_v60 }
 0x29d   : > { %v597_v55 = vpop.xlane.xlu0 %596  ;;  %2445 = vrcp.f32 %v594_v50  ;;  %v3026_v53 = vmul.f32 %v2436_v58, %v2952_v1 }
 0x29e   : > { %4043 = vst [vmem:[#allocation15_spill] sm:$0xff] %v3023_v49  ;;  %2447 = vrcp.f32 %v597_v55  ;;  %v656_v59 = vsel %vm456_vm0, %v3023_v49, -inf }
 0x29f   : > { %4044 = vst [vmem:[#allocation16_spill] sm:$0xff] %v3026_v53  ;;  %v2438_v63 = vpop.eup %2437  ;;  %657 = vmax.xlane.f32.xlu1 %v656_v59  ;;  %v659_v0 = vsel %vm456_vm0, %v3026_v53, -inf }
 0x2a0   : > { %v2440_v2 = vpop.eup %2439  ;;  %660 = vmax.xlane.f32.xlu0 %v659_v0  ;;  %v600_v3 = vpop.xlane.xlu1 %599  ;;  %v3033_v56 = vmul.f32 %v2438_v63, %v2959_v4 }
 0x2a1   : > { %2449 = vrcp.f32 %v600_v3  ;;  %v3036_v60 = vmul.f32 %v2440_v2, %v2961_v6 }
 0x2a2   : > { %4045 = vst [vmem:[#allocation17_spill] sm:$0xff] %v3033_v56  ;;  %v662_v1 = vsel %vm456_vm0, %v3033_v56, -inf }
 0x2a3   : > { %4046 = vst [vmem:[#allocation18_spill] sm:$0xff] %v3036_v60  ;;  %v2442_v61 = vpop.eup %2441  ;;  %663 = vmax.xlane.f32.xlu1 %v662_v1  ;;  %v665_v5 = vsel %vm456_vm0, %v3036_v60, -inf }
 0x2a4   : > { %v2444_v7 = vpop.eup %2443  ;;  %666 = vmax.xlane.f32.xlu0 %v665_v5  ;;  %v3043_v8 = vmul.f32 %v2442_v61, %v2967_v62 }
 0x2a5   : > { %v3046_v4 = vmul.f32 %v2444_v7, %v2969_v9 }
 0x2a6   : > { %4047 = vst [vmem:[#allocation19_spill] sm:$0xff] %v3043_v8  ;;  %v668_v6 = vsel %vm456_vm0, %v3043_v8, -inf }
 0x2a7   : > { %4048 = vst [vmem:[#allocation20_spill] sm:$0xff] %v3046_v4  ;;  %v2446_v10 = vpop.eup %2445  ;;  %669 = vmax.xlane.f32.xlu1 %v668_v6  ;;  %v671_v11 = vsel %vm456_vm0, %v3046_v4, -inf }
 0x2a8   : > { %v2448_v14 = vpop.eup %2447  ;;  %672 = vmax.xlane.f32.xlu0 %v671_v11  ;;  %v3053_v15 = vmul.f32 %v2446_v10, %v2975_v12  ;;  %v633_v12 = vlaneseq }
 0x2a9   : > { %v3056_v17 = vmul.f32 %v2448_v14, %v2977_v13 }
 0x2aa   : > { %4049 = vst [vmem:[#allocation21_spill] sm:$0xff] %v3053_v15  ;;  %v674_v62 = vsel %vm456_vm0, %v3053_v15, -inf  ;;  %v3067_v22 = vand.u32 127, %v633_v12 }
 0x2ab   : > { %4050 = vst [vmem:[#allocation22_spill] sm:$0xff] %v3056_v17  ;;  %v2450_v9 = vpop.eup %2449  ;;  %675 = vmax.xlane.f32.xlu1 %v674_v62  ;;  %v677_v18 = vsel %vm456_vm0, %v3056_v17, -inf }
 0x2ac   : > { %678 = vmax.xlane.f32.xlu0 %v677_v18  ;;  %v3063_v19 = vmul.f32 %v2450_v9, %v2983_v16 }
 0x2ae   : > { %4051 = vst [vmem:[#allocation23_spill] sm:$0xff] %v3063_v19  ;;  %v680_v20 = vsel %vm456_vm0, %v3063_v19, -inf }
 0x2af   : > { %681 = vmax.xlane.f32.xlu1 %v680_v20 }
 0x31b   : > { %v637_v13 = vpop.xlane.xlu0 %636 }
 0x31c   : > { %vm683_vm1 = vcmp.eq.f32.partialorder %v2988_v25, %v637_v13 }
 0x31d   : > { %v699_v23 = vsel %vm683_vm1, %v3067_v22, 4 }
 0x31e   : > { %v3072_v24 = vsel %vm456_vm0, %v699_v23, 2147483647 }
 0x31f   : > { %v643_v26 = vpop.xlane.xlu0 %642  ;;  %v717_v27 = vshra.s32 %v3072_v24, 16 }
 0x320   : > { %v640_v16 = vpop.xlane.xlu1 %639  ;;  %vm685_vm2 = vcmp.eq.f32.partialorder %v2993_v33, %v643_v26 }
 0x321   : > { %vm684_vm3 = vcmp.eq.f32.partialorder %v2996_v36, %v640_v16  ;;  %v701_v28 = vsel %vm685_vm2, %v3067_v22, 4  ;;  %v3078_v30 = vcvt.s32.f32 %v717_v27 }
 0x322   : > { %v700_v31 = vsel %vm684_vm3, %v3067_v22, 4  ;;  %v3082_v34 = vsel %vm456_vm0, %v701_v28, 2147483647 }
 0x323   : > { %v3085_v35 = vsel %vm456_vm0, %v700_v31, 2147483647  ;;  %720 = vmin.xlane.f32.xlu0 %v3078_v30  ;;  %v747_v21 = vshra.s32 %v3082_v34, 16 }
 0x324   : > { %v646_v37 = vpop.xlane.xlu1 %645  ;;  %v732_v38 = vshra.s32 %v3085_v35, 16 }
 0x325   : > { %vm686_vm4 = vcmp.eq.f32.partialorder %v3003_v43, %v646_v37  ;;  %v649_v40 = vpop.xlane.xlu0 %648  ;;  %v3091_v41 = vcvt.s32.f32 %v747_v21 }
 0x326   : > { %v702_v29 = vsel %vm686_vm4, %v3067_v22, 4  ;;  %vm687_vm5 = vcmp.eq.f32.partialorder %v3006_v32, %v649_v40  ;;  %v3095_v45 = vcvt.s32.f32 %v732_v38 }
 0x327   : > { %v3098_v46 = vsel %vm456_vm0, %v702_v29, 2147483647  ;;  %v703_v44 = vsel %vm687_vm5, %v3067_v22, 4  ;;  %750 = vmin.xlane.f32.xlu0 %v3091_v41 }
 0x328   : > { %v3103_v47 = vsel %vm456_vm0, %v703_v44, 2147483647  ;;  %735 = vmin.xlane.f32.xlu1 %v3095_v45  ;;  %v652_v48 = vpop.xlane.xlu1 %651  ;;  %v762_v51 = vshra.s32 %v3098_v46, 16 }
 0x329   : > { %vm688_vm6 = vcmp.eq.f32.partialorder %v3013_v39, %v652_v48  ;;  %v655_v52 = vpop.xlane.xlu0 %654  ;;  %v777_v54 = vshra.s32 %v3103_v47, 16 }
 0x32a   : > { %v704_v57 = vsel %vm688_vm6, %v3067_v22, 4  ;;  %vm689_vm7 = vcmp.eq.f32.partialorder %v3016_v42, %v655_v52  ;;  %v3111_v58 = vcvt.s32.f32 %v762_v51 }
 0x32b   : > { %v3114_v50 = vsel %vm456_vm0, %v704_v57, 2147483647  ;;  %v705_v55 = vsel %vm689_vm7, %v3067_v22, 4  ;;  %v3117_v59 = vcvt.s32.f32 %v777_v54 }
 0x32c   : > { %v3120_v63 = vsel %vm456_vm0, %v705_v55, 2147483647  ;;  %765 = vmin.xlane.f32.xlu1 %v3111_v58  ;;  %v658_v0 = vpop.xlane.xlu1 %657  ;;  %v792_v2 = vshra.s32 %v3114_v50, 16 }
 0x32d   : > { %vm690_vm8 = vcmp.eq.f32.partialorder %v3023_v49, %v658_v0  ;;  %780 = vmin.xlane.f32.xlu0 %v3117_v59  ;;  %v661_v3 = vpop.xlane.xlu0 %660  ;;  %v807_v1 = vshra.s32 %v3120_v63, 16 }
 0x32e   : > { %v706_v61 = vsel %vm690_vm8, %v3067_v22, 4  ;;  %vm691_vm9 = vcmp.eq.f32.partialorder %v3026_v53, %v661_v3  ;;  %v3129_v5 = vcvt.s32.f32 %v792_v2 }
 0x32f   : > { %v3132_v7 = vsel %vm456_vm0, %v706_v61, 2147483647  ;;  %v707_v6 = vsel %vm691_vm9, %v3067_v22, 4  ;;  %v3135_v10 = vcvt.s32.f32 %v807_v1 }
 0x330   : > { %v3138_v11 = vsel %vm456_vm0, %v707_v6, 2147483647  ;;  %795 = vmin.xlane.f32.xlu1 %v3129_v5  ;;  %v664_v14 = vpop.xlane.xlu1 %663  ;;  %v822_v62 = vshra.s32 %v3132_v7, 16 }
 0x331   : > { %vm692_vm10 = vcmp.eq.f32.partialorder %v3033_v56, %v664_v14  ;;  %810 = vmin.xlane.f32.xlu0 %v3135_v10  ;;  %v667_v9 = vpop.xlane.xlu0 %666  ;;  %v837_v18 = vshra.s32 %v3138_v11, 16 }
 0x332   : > { %v708_v20 = vsel %vm692_vm10, %v3067_v22, 4  ;;  %vm693_vm11 = vcmp.eq.f32.partialorder %v3036_v60, %v667_v9  ;;  %v3147_v12 = vcvt.s32.f32 %v822_v62 }
 0x333   : > { %v3150_v13 = vsel %vm456_vm0, %v708_v20, 2147483647  ;;  %v709_v23 = vsel %vm693_vm11, %v3067_v22, 4  ;;  %v3153_v26 = vcvt.s32.f32 %v837_v18 }
 0x334   : > { %v3156_v27 = vsel %vm456_vm0, %v709_v23, 2147483647  ;;  %825 = vmin.xlane.f32.xlu1 %v3147_v12  ;;  %v670_v16 = vpop.xlane.xlu1 %669  ;;  %v852_v28 = vshra.s32 %v3150_v13, 16 }
 0x335   : > { %vm694_vm12 = vcmp.eq.f32.partialorder %v3043_v8, %v670_v16  ;;  %840 = vmin.xlane.f32.xlu0 %v3153_v26  ;;  %v673_v31 = vpop.xlane.xlu0 %672  ;;  %v867_v21 = vshra.s32 %v3156_v27, 16 }
 0x336   : > { %v710_v37 = vsel %vm694_vm12, %v3067_v22, 4  ;;  %vm695_vm13 = vcmp.eq.f32.partialorder %v3046_v4, %v673_v31  ;;  %v3165_v38 = vcvt.s32.f32 %v852_v28  ;;  %v716_v31 = vand.u32 65535, %v3072_v24 }
 0x337   : > { %v3168_v40 = vsel %vm456_vm0, %v710_v37, 2147483647  ;;  %v711_v29 = vsel %vm695_vm13, %v3067_v22, 4  ;;  %v3171_v44 = vcvt.s32.f32 %v867_v21  ;;  %v761_v24 = vand.u32 65535, %v3098_v46 }
 0x338   : > { %v3174_v48 = vsel %vm456_vm0, %v711_v29, 2147483647  ;;  %855 = vmin.xlane.f32.xlu1 %v3165_v38  ;;  %v676_v51 = vpop.xlane.xlu1 %675  ;;  %v882_v52 = vshra.s32 %v3168_v40, 16  ;;  %v718_v37 = vcvt.s32.f32 %v716_v31  ;;  %v746_v29 = vand.u32 65535, %v3082_v34 }
 0x339   : > { %vm696_vm14 = vcmp.eq.f32.partialorder %v3053_v15, %v676_v51  ;;  %870 = vmin.xlane.f32.xlu0 %v3171_v44  ;;  %v679_v54 = vpop.xlane.xlu0 %678  ;;  %v897_v57 = vshra.s32 %v3174_v48, 16  ;;  %v731_v51 = vand.u32 65535, %v3085_v35  ;;  %v806_v46 = vand.u32 65535, %v3120_v63 }
 0x33a   : > { %v712_v55 = vsel %vm696_vm14, %v3067_v22, 4  ;;  %vm697_vm15 = vcmp.eq.f32.partialorder %v3056_v17, %v679_v54  ;;  %v3183_v0 = vcvt.s32.f32 %v882_v52  ;;  %v836_v63 = vand.u32 65535, %v3138_v11 }
 0x33b   : > { %v3186_v2 = vsel %vm456_vm0, %v712_v55, 2147483647  ;;  %v713_v3 = vsel %vm697_vm15, %v3067_v22, 4  ;;  %v3189_v1 = vcvt.s32.f32 %v897_v57  ;;  %v748_v57 = vcvt.s32.f32 %v746_v29 }
 0x33c   : > { %v3192_v61 = vsel %vm456_vm0, %v713_v3, 2147483647  ;;  %885 = vmin.xlane.f32.xlu1 %v3183_v0  ;;  %v682_v6 = vpop.xlane.xlu1 %681  ;;  %v912_v14 = vshra.s32 %v3186_v2, 16  ;;  %v733_v3 = vcvt.s32.f32 %v731_v51  ;;  %v866_v11 = vand.u32 65535, %v3156_v27 }
 0x33d   : > { %vm698_vm1 = vcmp.eq.f32.partialorder %v3063_v19, %v682_v6  ;;  %900 = vmin.xlane.f32.xlu0 %v3189_v1  ;;  %v927_v62 = vshra.s32 %v3192_v61, 16  ;;  %v896_v27 = vand.u32 65535, %v3174_v48  ;;  %v926_v48 = vand.u32 65535, %v3192_v61 }
 0x33e   : > { %v714_v9 = vsel %vm698_vm1, %v3067_v22, 4  ;;  %v3200_v18 = vcvt.s32.f32 %v912_v14  ;;  %v763_v14 = vcvt.s32.f32 %v761_v24 }
 0x33f   : > { %v3203_v20 = vsel %vm456_vm0, %v714_v9, 2147483647  ;;  %v3205_v23 = vcvt.s32.f32 %v927_v62  ;;  %v791_v62 = vand.u32 65535, %v3114_v50  ;;  %v821_v50 = vand.u32 65535, %v3132_v7 }
 0x340   : > { %915 = vmin.xlane.f32.xlu1 %v3200_v18  ;;  %v942_v16 = vshra.s32 %v3203_v20, 16  ;;  %v851_v7 = vand.u32 65535, %v3150_v13  ;;  %v881_v13 = vand.u32 65535, %v3168_v40  ;;  %v911_v40 = vand.u32 65535, %v3186_v2 }
 0x341   : > { %930 = vmin.xlane.f32.xlu0 %v3205_v23  ;;  %v793_v31 = vcvt.s32.f32 %v791_v62  ;;  %v941_v2 = vand.u32 65535, %v3203_v20 }
 0x342   : > { %v3210_v28 = vcvt.s32.f32 %v942_v16  ;;  %v883_v62 = vcvt.s32.f32 %v881_v13 }
 0x344   : > { %945 = vmin.xlane.f32.xlu1 %v3210_v28 }
 0x3b0   : > { %v3214_v21 = vpop.xlane.xlu0 %720 }
 0x3b1   : > { %vm722_vm2 = vcmp.eq.f32.partialorder %v3078_v30, %v3214_v21  ;;  %v776_v30 = vand.u32 65535, %v3103_v47 }
 0x3b2   : > { %v723_v52 = vsel %vm722_vm2, %v718_v37, inf }
 0x3b3   : > { %724 = vmin.xlane.f32.xlu0 %v723_v52  ;;  %v823_v52 = vcvt.s32.f32 %v821_v50 }
 0x3b4   : > { %v3220_v54 = vpop.xlane.xlu0 %750 }
 0x3b5   : > { %v3222_v55 = vpop.xlane.xlu1 %735  ;;  %vm752_vm3 = vcmp.eq.f32.partialorder %v3091_v41, %v3220_v54  ;;  %v778_v41 = vcvt.s32.f32 %v776_v30 }
 0x3b6   : > { %vm737_vm4 = vcmp.eq.f32.partialorder %v3095_v45, %v3222_v55  ;;  %v753_v34 = vsel %vm752_vm3, %v748_v57, inf }
 0x3b7   : > { %v738_v35 = vsel %vm737_vm4, %v733_v3, inf  ;;  %754 = vmin.xlane.f32.xlu0 %v753_v34  ;;  %v853_v34 = vcvt.s32.f32 %v851_v7 }
 0x3b8   : > { %739 = vmin.xlane.f32.xlu1 %v738_v35 }
 0x3b9   : > { %v3230_v6 = vpop.xlane.xlu1 %765 }
 0x3ba   : > { %v3233_v9 = vpop.xlane.xlu0 %780  ;;  %vm767_vm5 = vcmp.eq.f32.partialorder %v3111_v58, %v3230_v6  ;;  %v808_v58 = vcvt.s32.f32 %v806_v46 }
 0x3bb   : > { %v768_v45 = vsel %vm767_vm5, %v763_v14, inf  ;;  %vm782_vm6 = vcmp.eq.f32.partialorder %v3117_v59, %v3233_v9 }
 0x3bc   : > { %769 = vmin.xlane.f32.xlu1 %v768_v45  ;;  %v783_v47 = vsel %vm782_vm6, %v778_v41, inf }
 0x3bd   : > { %784 = vmin.xlane.f32.xlu0 %v783_v47  ;;  %v3240_v16 = vpop.xlane.xlu1 %795  ;;  %v913_v47 = vcvt.s32.f32 %v911_v40 }
 0x3be   : > { %v3243_v37 = vpop.xlane.xlu0 %810  ;;  %vm797_vm7 = vcmp.eq.f32.partialorder %v3129_v5, %v3240_v16  ;;  %v838_v5 = vcvt.s32.f32 %v836_v63  ;;  %v727_v63 = vcvt.f32.s32 %v3214_v21 }
 0x3bf   : > { %v798_v29 = vsel %vm797_vm7, %v793_v31, inf  ;;  %vm812_vm8 = vcmp.eq.f32.partialorder %v3135_v10, %v3243_v37 }
 0x3c0   : > { %799 = vmin.xlane.f32.xlu1 %v798_v29  ;;  %v813_v59 = vsel %vm812_vm8, %v808_v58, inf  ;;  %v943_v58 = vcvt.s32.f32 %v941_v2 }
 0x3c1   : > { %814 = vmin.xlane.f32.xlu0 %v813_v59  ;;  %v3250_v51 = vpop.xlane.xlu1 %825  ;;  %v728_v59 = vshll.u32 %v727_v63, 16 }
 0x3c2   : > { %v3253_v57 = vpop.xlane.xlu0 %840  ;;  %vm827_vm9 = vcmp.eq.f32.partialorder %v3147_v12, %v3250_v51  ;;  %v868_v12 = vcvt.s32.f32 %v866_v11 }
 0x3c3   : > { %v828_v3 = vsel %vm827_vm9, %v823_v52, inf  ;;  %vm842_vm10 = vcmp.eq.f32.partialorder %v3153_v26, %v3253_v57 }
 0x3c4   : > { %829 = vmin.xlane.f32.xlu1 %v828_v3  ;;  %v843_v10 = vsel %vm842_vm10, %v838_v5, inf  ;;  %v772_v3 = vcvt.f32.s32 %v3230_v6 }
 0x3c5   : > { %844 = vmin.xlane.f32.xlu0 %v843_v10  ;;  %v3260_v24 = vpop.xlane.xlu1 %855  ;;  %v787_v10 = vcvt.f32.s32 %v3233_v9 }
 0x3c6   : > { %v3263_v30 = vpop.xlane.xlu0 %870  ;;  %vm857_vm11 = vcmp.eq.f32.partialorder %v3165_v38, %v3260_v24  ;;  %v898_v38 = vcvt.s32.f32 %v896_v27  ;;  %v773_v9 = vshll.u32 %v772_v3, 16 }
 0x3c7   : > { %v858_v35 = vsel %vm857_vm11, %v853_v34, inf  ;;  %vm872_vm12 = vcmp.eq.f32.partialorder %v3171_v44, %v3263_v30  ;;  %v788_v27 = vshll.u32 %v787_v10, 16 }
 0x3c8   : > { %859 = vmin.xlane.f32.xlu1 %v858_v35  ;;  %v873_v26 = vsel %vm872_vm12, %v868_v12, inf }
 0x3c9   : > { %874 = vmin.xlane.f32.xlu0 %v873_v26  ;;  %v3270_v14 = vpop.xlane.xlu1 %885  ;;  %v802_v26 = vcvt.f32.s32 %v3240_v16 }
 0x3ca   : > { %v3273_v41 = vpop.xlane.xlu0 %900  ;;  %vm887_vm13 = vcmp.eq.f32.partialorder %v3183_v0, %v3270_v14  ;;  %v928_v0 = vcvt.s32.f32 %v926_v48  ;;  %v817_v48 = vcvt.f32.s32 %v3243_v37 }
 0x3cb   : > { %v888_v46 = vsel %vm887_vm13, %v883_v62, inf  ;;  %vm902_vm14 = vcmp.eq.f32.partialorder %v3189_v1, %v3273_v41 }
 0x3cc   : > { %889 = vmin.xlane.f32.xlu1 %v888_v46  ;;  %v903_v44 = vsel %vm902_vm14, %v898_v38, inf }
 0x3cd   : > { %904 = vmin.xlane.f32.xlu0 %v903_v44  ;;  %v3280_v45 = vpop.xlane.xlu1 %915 }
 0x3ce   : > { %v3283_v31 = vpop.xlane.xlu0 %930  ;;  %vm917_vm15 = vcmp.eq.f32.partialorder %v3200_v18, %v3280_v45  ;;  %v757_v18 = vcvt.f32.s32 %v3220_v54 }
 0x3cf   : > { %v918_v50 = vsel %vm917_vm15, %v913_v47, inf  ;;  %vm932_vm1 = vcmp.eq.f32.partialorder %v3205_v23, %v3283_v31  ;;  %v742_v23 = vcvt.f32.s32 %v3222_v55 }
 0x3d0   : > { %919 = vmin.xlane.f32.xlu1 %v918_v50  ;;  %v933_v1 = vsel %vm932_vm1, %v928_v0, inf  ;;  %v758_v5 = vshll.u32 %v757_v18, 16  ;;  %v832_v0 = vcvt.f32.s32 %v3250_v51  ;;  %v818_v18 = vshll.u32 %v817_v48, 16 }
 0x3d1   : > { %934 = vmin.xlane.f32.xlu0 %v933_v1  ;;  %v3289_v61 = vpop.xlane.xlu1 %945  ;;  %v743_v21 = vshll.u32 %v742_v23, 16  ;;  %v803_v1 = vshll.u32 %v802_v26, 16 }
 0x3d2   : > { %vm947_vm2 = vcmp.eq.f32.partialorder %v3210_v28, %v3289_v61  ;;  %v833_v23 = vshll.u32 %v832_v0, 16 }
 0x3d3   : > { %v948_v20 = vsel %vm947_vm2, %v943_v58, inf  ;;  %v847_v58 = vcvt.f32.s32 %v3253_v57 }
 0x3d4   : > { %949 = vmin.xlane.f32.xlu1 %v948_v20 }
 0x3d5   : > { %v848_v10 = vshll.u32 %v847_v58, 16 }
 0x440   : > { %v725_v29 = vpop.xlane.xlu0 %724 }
 0x441   : > { %v726_v52 = vcvt.f32.s32 %v725_v29 }
 0x443   : > { %v3296_v7 = vadd.s32 %v728_v59, %v726_v52 }
 0x444   : > { %v755_v11 = vpop.xlane.xlu0 %754 }
 0x445   : > { %v740_v28 = vpop.xlane.xlu1 %739  ;;  %v756_v34 = vcvt.f32.s32 %v755_v11  ;;  %vm955_vm3 = vcmp.eq.s32.totalorder %v3067_v22, %v3296_v7 }
 0x446   : > { %v741_v54 = vcvt.f32.s32 %v740_v28  ;;  %v3306_v55 = vsel %vm955_vm3, -inf, %v2988_v25  ;;  %v862_v28 = vcvt.f32.s32 %v3260_v24 }
 0x447   : > { %v3308_v13 = vadd.s32 %v758_v5, %v756_v34  ;;  %v1003_v6 = vsel %vm456_vm0, %v3306_v55, -inf }
 0x448   : > { %v3312_v12 = vadd.s32 %v743_v21, %v741_v54  ;;  %1004 = vmax.xlane.f32.xlu0 %v1003_v6  ;;  %v877_v54 = vcvt.f32.s32 %v3263_v30  ;;  %v863_v48 = vshll.u32 %v862_v28, 16 }
 0x449   : > { %v770_v35 = vpop.xlane.xlu1 %769  ;;  %vm957_vm4 = vcmp.eq.s32.totalorder %v3067_v22, %v3308_v13 }
 0x44a   : > { %v771_v62 = vcvt.f32.s32 %v770_v35  ;;  %v785_v40 = vpop.xlane.xlu0 %784  ;;  %vm956_vm5 = vcmp.eq.s32.totalorder %v3067_v22, %v3312_v12  ;;  %v3323_v38 = vsel %vm957_vm4, -inf, %v2993_v33  ;;  %v892_v35 = vcvt.f32.s32 %v3270_v14 }
 0x44b   : > { %v786_v46 = vcvt.f32.s32 %v785_v40  ;;  %v3330_v44 = vsel %vm956_vm5, -inf, %v2996_v36  ;;  %v1009_v16 = vsel %vm456_vm0, %v3323_v38, -inf  ;;  %v878_v0 = vshll.u32 %v877_v54, 16 }
 0x44c   : > { %v3334_v47 = vadd.s32 %v773_v9, %v771_v62  ;;  %v1006_v2 = vsel %vm456_vm0, %v3330_v44, -inf  ;;  %1010 = vmax.xlane.f32.xlu0 %v1009_v16 }
 0x44d   : > { %v3339_v50 = vadd.s32 %v788_v27, %v786_v46  ;;  %1007 = vmax.xlane.f32.xlu1 %v1006_v2  ;;  %v800_v37 = vpop.xlane.xlu1 %799  ;;  %v907_v46 = vcvt.f32.s32 %v3273_v41 }
 0x44e   : > { %v801_v20 = vcvt.f32.s32 %v800_v37  ;;  %v815_v63 = vpop.xlane.xlu0 %814  ;;  %vm958_vm6 = vcmp.eq.s32.totalorder %v3067_v22, %v3334_v47 }
 0x44f   : > { %v816_v29 = vcvt.f32.s32 %v815_v63  ;;  %v3348_v59 = vsel %vm958_vm6, -inf, %v3003_v43  ;;  %vm959_vm7 = vcmp.eq.s32.totalorder %v3067_v22, %v3339_v50  ;;  %v974_v13 = vsel %vm958_vm6, %v3003_v43, 0.0 }
 0x450   : > { %v3352_v51 = vadd.s32 %v803_v1, %v801_v20  ;;  %v1012_v57 = vsel %vm456_vm0, %v3348_v59, -inf  ;;  %v3360_v52 = vsel %vm959_vm7, -inf, %v3006_v32  ;;  %v893_v20 = vshll.u32 %v892_v35, 16 }
 0x451   : > { %v3362_v5 = vadd.s32 %v818_v18, %v816_v29  ;;  %1013 = vmax.xlane.f32.xlu1 %v1012_v57  ;;  %v830_v11 = vpop.xlane.xlu1 %829  ;;  %v1015_v3 = vsel %vm456_vm0, %v3360_v52, -inf  ;;  %v908_v57 = vshll.u32 %v907_v46, 16 }
 0x452   : > { %v831_v34 = vcvt.f32.s32 %v830_v11  ;;  %1016 = vmax.xlane.f32.xlu0 %v1015_v3  ;;  %v845_v21 = vpop.xlane.xlu0 %844  ;;  %vm960_vm8 = vcmp.eq.s32.totalorder %v3067_v22, %v3352_v51 }
 0x453   : > { %v846_v6 = vcvt.f32.s32 %v845_v21  ;;  %v3374_v9 = vsel %vm960_vm8, -inf, %v3013_v39  ;;  %vm961_vm9 = vcmp.eq.s32.totalorder %v3067_v22, %v3362_v5 }
 0x454   : > { %v3378_v27 = vadd.s32 %v833_v23, %v831_v34  ;;  %v1018_v24 = vsel %vm456_vm0, %v3374_v9, -inf  ;;  %v3386_v30 = vsel %vm961_vm9, -inf, %v3016_v42  ;;  %v922_v23 = vcvt.f32.s32 %v3280_v45 }
 0x455   : > { %v3389_v26 = vadd.s32 %v848_v10, %v846_v6  ;;  %1019 = vmax.xlane.f32.xlu1 %v1018_v24  ;;  %v860_v62 = vpop.xlane.xlu1 %859  ;;  %v1021_v40 = vsel %vm456_vm0, %v3386_v30, -inf  ;;  %v937_v10 = vcvt.f32.s32 %v3283_v31 }
 0x456   : > { %4052 = vst [vmem:[#allocation24_spill] sm:$0xff] %v3378_v27  ;;  %v861_v16 = vcvt.f32.s32 %v860_v62  ;;  %1022 = vmax.xlane.f32.xlu0 %v1021_v40  ;;  %v875_v2 = vpop.xlane.xlu0 %874  ;;  %vm962_vm10 = vcmp.eq.s32.totalorder %v3067_v22, %v3378_v27  ;;  %v923_v35 = vshll.u32 %v922_v23, 16  ;;  %v952_v62 = vcvt.f32.s32 %v3289_v61 }
 0x457   : > { %4053 = vst [vmem:[#allocation25_spill] sm:$0xff] %v3389_v26  ;;  %v876_v37 = vcvt.f32.s32 %v875_v2  ;;  %v3400_v14 = vsel %vm962_vm10, -inf, %v3023_v49  ;;  %vm963_vm11 = vcmp.eq.s32.totalorder %v3067_v22, %v3389_v26  ;;  %v938_v46 = vshll.u32 %v937_v10, 16 }
 0x458   : > { %4054 = vst [vmem:[#allocation26_spill] sm:$0xff] %v3400_v14  ;;  %v3404_v1 = vadd.s32 %v863_v48, %v861_v16  ;;  %v1024_v41 = vsel %vm456_vm0, %v3400_v14, -inf  ;;  %v3412_v58 = vsel %vm963_vm11, -inf, %v3026_v53 }
 0x459   : > { %4056 = vst [vmem:[#allocation28_spill] sm:$0xff] %v3412_v58  ;;  %v3414_v63 = vadd.s32 %v878_v0, %v876_v37  ;;  %1025 = vmax.xlane.f32.xlu1 %v1024_v41  ;;  %v890_v18 = vpop.xlane.xlu1 %889  ;;  %v1027_v29 = vsel %vm456_vm0, %v3412_v58, -inf }
 0x45a   : > { %4055 = vst [vmem:[#allocation27_spill] sm:$0xff] %v3404_v1  ;;  %v891_v11 = vcvt.f32.s32 %v890_v18  ;;  %1028 = vmax.xlane.f32.xlu0 %v1027_v29  ;;  %v905_v3 = vpop.xlane.xlu0 %904  ;;  %vm964_vm12 = vcmp.eq.s32.totalorder %v3067_v22, %v3404_v1  ;;  %v953_v29 = vshll.u32 %v952_v62, 16 }
 0x45b   : > { %4057 = vst [vmem:[#allocation29_spill] sm:$0xff] %v3414_v63  ;;  %v906_v28 = vcvt.f32.s32 %v905_v3  ;;  %v3426_v34 = vsel %vm964_vm12, -inf, %v3033_v56  ;;  %vm4031_vm13 = vcmp.eq.s32.totalorder %v3067_v22, %v3414_v63 }
 0x45c   : > { %4058 = vst [vmem:[#allocation30_spill] sm:$0xff] %v3426_v34  ;;  %v3430_v21 = vadd.s32 %v893_v20, %v891_v11  ;;  %v1030_v45 = vsel %vm456_vm0, %v3426_v34, -inf  ;;  %v3438_v31 = vsel %vm4031_vm13, -inf, %v3036_v60 }
 0x45d   : > { %4060 = vst [vmem:[#allocation32_spill] sm:$0xff] %v3438_v31  ;;  %v3440_v54 = vadd.s32 %v908_v57, %v906_v28  ;;  %1031 = vmax.xlane.f32.xlu1 %v1030_v45  ;;  %v920_v6 = vpop.xlane.xlu1 %919  ;;  %v1033_v24 = vsel %vm456_vm0, %v3438_v31, -inf }
 0x45e   : > { %4059 = vst [vmem:[#allocation31_spill] sm:$0xff] %v3430_v21  ;;  %v921_v40 = vcvt.f32.s32 %v920_v6  ;;  %1034 = vmax.xlane.f32.xlu0 %v1033_v24  ;;  %v935_v48 = vpop.xlane.xlu0 %934  ;;  %vm4030_vm14 = vcmp.eq.s32.totalorder %v3067_v22, %v3430_v21 }
 0x45f   : > { %4061 = vst [vmem:[#allocation33_spill] sm:$0xff] %v3440_v54  ;;  %v936_v16 = vcvt.f32.s32 %v935_v48  ;;  %v3451_v2 = vsel %vm4030_vm14, -inf, %v3043_v8  ;;  %vm4001_vm15 = vcmp.eq.s32.totalorder %v3067_v22, %v3440_v54 }
 0x460   : > { %4062 = vst [vmem:[#allocation34_spill] sm:$0xff] %v3451_v2  ;;  %v3455_v0 = vadd.s32 %v923_v35, %v921_v40  ;;  %v1036_v61 = vsel %vm456_vm0, %v3451_v2, -inf  ;;  %v3463_v37 = vsel %vm4001_vm15, -inf, %v3046_v4 }
 0x461   : > { %4064 = vst [vmem:[#allocation36_spill] sm:$0xff] %v3463_v37  ;;  %v3465_v41 = vadd.s32 %v938_v46, %v936_v16  ;;  %1037 = vmax.xlane.f32.xlu1 %v1036_v61  ;;  %v950_v20 = vpop.xlane.xlu1 %949  ;;  %v1039_v18 = vsel %vm456_vm0, %v3463_v37, -inf }
 0x462   : > { %4063 = vst [vmem:[#allocation35_spill] sm:$0xff] %v3455_v0  ;;  %v951_v57 = vcvt.f32.s32 %v950_v20  ;;  %1040 = vmax.xlane.f32.xlu0 %v1039_v18  ;;  %vm3999_vm1 = vcmp.eq.s32.totalorder %v3067_v22, %v3455_v0 }
 0x463   : > { %4065 = vst [vmem:[#allocation37_spill] sm:$0xff] %v3465_v41  ;;  %v3475_v23 = vsel %vm3999_vm1, -inf, %v3053_v15  ;;  %vm4000_vm2 = vcmp.eq.s32.totalorder %v3067_v22, %v3465_v41 }
 0x464   : > { %4066 = vst [vmem:[#allocation38_spill] sm:$0xff] %v3475_v23  ;;  %v3479_v11 = vadd.s32 %v953_v29, %v951_v57  ;;  %v1042_v3 = vsel %vm456_vm0, %v3475_v23, -inf  ;;  %v3487_v10 = vsel %vm4000_vm2, -inf, %v3056_v17 }
 0x465   : > { %4068 = vst [vmem:[#allocation40_spill] sm:$0xff] %v3487_v10  ;;  %1043 = vmax.xlane.f32.xlu1 %v1042_v3  ;;  %v1045_v28 = vsel %vm456_vm0, %v3487_v10, -inf }
 0x466   : > { %4067 = vst [vmem:[#allocation39_spill] sm:$0xff] %v3479_v11  ;;  %1046 = vmax.xlane.f32.xlu0 %v1045_v28  ;;  %vm4002_vm1 = vcmp.eq.s32.totalorder %v3067_v22, %v3479_v11 }
 0x467   : > { %v3497_v45 = vsel %vm4002_vm1, -inf, %v3063_v19 }
 0x468   : > { %4069 = vst [vmem:[#allocation41_spill] sm:$0xff] %v3497_v45  ;;  %v1048_v6 = vsel %vm456_vm0, %v3497_v45, -inf }
 0x469   : > { %1049 = vmax.xlane.f32.xlu1 %v1048_v6 }
 0x4d5   : > { %v1005_v24 = vpop.xlane.xlu0 %1004 }
 0x4d6   : > { %vm1051_vm2 = vcmp.eq.f32.partialorder %v3306_v55, %v1005_v24 }
 0x4d7   : > { %v1067_v35 = vsel %vm1051_vm2, %v3067_v22, 4 }
 0x4d8   : > { %v3504_v62 = vsel %vm456_vm0, %v1067_v35, 2147483647 }
 0x4d9   : > { %v1011_v40 = vpop.xlane.xlu0 %1010  ;;  %v1085_v48 = vshra.s32 %v3504_v62, 16 }
 0x4da   : > { %v1008_v46 = vpop.xlane.xlu1 %1007  ;;  %vm1053_vm15 = vcmp.eq.f32.partialorder %v3323_v38, %v1011_v40 }
 0x4db   : > { %vm1052_vm1 = vcmp.eq.f32.partialorder %v3330_v44, %v1008_v46  ;;  %v1069_v16 = vsel %vm1053_vm15, %v3067_v22, 4  ;;  %v3510_v61 = vcvt.s32.f32 %v1085_v48 }
 0x4dc   : > { %v1068_v20 = vsel %vm1052_vm1, %v3067_v22, 4  ;;  %v3514_v18 = vsel %vm456_vm0, %v1069_v16, 2147483647 }
 0x4dd   : > { %v3517_v29 = vsel %vm456_vm0, %v1068_v20, 2147483647  ;;  %v1115_v57 = vshra.s32 %v3514_v18, 16  ;;  %1088 = vmin.xlane.f32.xlu0 %v3510_v61 }
 0x4de   : > { %v1014_v3 = vpop.xlane.xlu1 %1013  ;;  %v1100_v28 = vshra.s32 %v3517_v29, 16 }
 0x4df   : > { %vm1054_vm2 = vcmp.eq.f32.partialorder %v3348_v59, %v1014_v3  ;;  %v1017_v6 = vpop.xlane.xlu0 %1016  ;;  %v3523_v24 = vcvt.s32.f32 %v1115_v57 }
 0x4e0   : > { %v1070_v35 = vsel %vm1054_vm2, %v3067_v22, 4  ;;  %vm1055_vm15 = vcmp.eq.f32.partialorder %v3360_v52, %v1017_v6  ;;  %v3527_v40 = vcvt.s32.f32 %v1100_v28 }
 0x4e1   : > { %v3530_v48 = vsel %vm456_vm0, %v1070_v35, 2147483647  ;;  %v1071_v46 = vsel %vm1055_vm15, %v3067_v22, 4  ;;  %1118 = vmin.xlane.f32.xlu0 %v3523_v24 }
 0x4e2   : > { %v1130_v16 = vshra.s32 %v3530_v48, 16  ;;  %v3536_v20 = vsel %vm456_vm0, %v1071_v46, 2147483647  ;;  %1103 = vmin.xlane.f32.xlu1 %v3527_v40  ;;  %v1020_v57 = vpop.xlane.xlu1 %1019  ;;  %v1129_v27 = vand.u32 65535, %v3530_v48 }
 0x4e3   : > { %v1145_v3 = vshra.s32 %v3536_v20, 16  ;;  %vm1056_vm1 = vcmp.eq.f32.partialorder %v3374_v9, %v1020_v57  ;;  %v1023_v28 = vpop.xlane.xlu0 %1022 }
 0x4e4   : > { %v1072_v6 = vsel %vm1056_vm1, %v3067_v22, 4  ;;  %vm1057_vm2 = vcmp.eq.f32.partialorder %v3386_v30, %v1023_v28  ;;  %v3543_v35 = vcvt.s32.f32 %v1130_v16  ;;  %v1131_v48 = vcvt.s32.f32 %v1129_v27 }
 0x4e5   : > { %v3546_v11 = vsel %vm456_vm0, %v1072_v6, 2147483647  ;;  %v1073_v46 = vsel %vm1057_vm2, %v3067_v22, 4  ;;  %v3549_v19 = vcvt.s32.f32 %v1145_v3 }
 0x4e6   : > { %v1160_v41 = vshra.s32 %v3546_v11, 16  ;;  %v3553_v17 = vsel %vm456_vm0, %v1073_v46, 2147483647  ;;  %1133 = vmin.xlane.f32.xlu1 %v3543_v35  ;;  %v1026_v57 = vpop.xlane.xlu1 %1025 }
 0x4e7   : > { %v1175_v0 = vshra.s32 %v3553_v17, 16  ;;  %vm1058_vm15 = vcmp.eq.f32.partialorder %v3400_v14, %v1026_v57  ;;  %1148 = vmin.xlane.f32.xlu0 %v3549_v19  ;;  %v1029_v16 = vpop.xlane.xlu0 %1028 }
 0x4e8   : > { %v1074_v28 = vsel %vm1058_vm15, %v3067_v22, 4  ;;  %vm1059_vm1 = vcmp.eq.f32.partialorder %v3412_v58, %v1029_v16  ;;  %v3561_v3 = vcvt.s32.f32 %v1160_v41 }
 0x4e9   : > { %v3564_v6 = vsel %vm456_vm0, %v1074_v28, 2147483647  ;;  %v1075_v46 = vsel %vm1059_vm1, %v3067_v22, 4  ;;  %v3567_v15 = vcvt.s32.f32 %v1175_v0 }
 0x4ea   : > { %v1190_v54 = vshra.s32 %v3564_v6, 16  ;;  %v3571_v57 = vsel %vm456_vm0, %v1075_v46, 2147483647  ;;  %1163 = vmin.xlane.f32.xlu1 %v3561_v3  ;;  %v1032_v4 = vpop.xlane.xlu1 %1031 }
 0x4eb   : > { %v1205_v21 = vshra.s32 %v3571_v57, 16  ;;  %vm1060_vm2 = vcmp.eq.f32.partialorder %v3426_v34, %v1032_v4  ;;  %1178 = vmin.xlane.f32.xlu0 %v3567_v15  ;;  %v1035_v41 = vpop.xlane.xlu0 %1034 }
 0x4ec   : > { %v1076_v16 = vsel %vm1060_vm2, %v3067_v22, 4  ;;  %vm1061_vm15 = vcmp.eq.f32.partialorder %v3438_v31, %v1035_v41  ;;  %v3579_v0 = vcvt.s32.f32 %v1190_v54 }
 0x4ed   : > { %v3582_v28 = vsel %vm456_vm0, %v1076_v16, 2147483647  ;;  %v1077_v46 = vsel %vm1061_vm15, %v3067_v22, 4  ;;  %v3585_v8 = vcvt.s32.f32 %v1205_v21 }
 0x4ee   : > { %v1220_v63 = vshra.s32 %v3582_v28, 16  ;;  %v3589_v4 = vsel %vm456_vm0, %v1077_v46, 2147483647  ;;  %1193 = vmin.xlane.f32.xlu1 %v3579_v0  ;;  %v1038_v34 = vpop.xlane.xlu1 %1037 }
 0x4ef   : > { %v1235_v60 = vshra.s32 %v3589_v4, 16  ;;  %vm1062_vm1 = vcmp.eq.f32.partialorder %v3451_v2, %v1038_v34  ;;  %1208 = vmin.xlane.f32.xlu0 %v3585_v8  ;;  %v1041_v54 = vpop.xlane.xlu0 %1040 }
 0x4f0   : > { %v1078_v41 = vsel %vm1062_vm1, %v3067_v22, 4  ;;  %vm1063_vm2 = vcmp.eq.f32.partialorder %v3463_v37, %v1041_v54  ;;  %v3597_v21 = vcvt.s32.f32 %v1220_v63 }
 0x4f1   : > { %v3600_v16 = vsel %vm456_vm0, %v1078_v41, 2147483647  ;;  %v1079_v46 = vsel %vm1063_vm2, %v3067_v22, 4  ;;  %v3603_v31 = vcvt.s32.f32 %v1235_v60 }
 0x4f2   : > { %v1250_v1 = vshra.s32 %v3600_v16, 16  ;;  %v3607_v34 = vsel %vm456_vm0, %v1079_v46, 2147483647  ;;  %1223 = vmin.xlane.f32.xlu1 %v3597_v21  ;;  %v1044_v2 = vpop.xlane.xlu1 %1043 }
 0x4f3   : > { %v1265_v56 = vshra.s32 %v3607_v34, 16  ;;  %vm1064_vm15 = vcmp.eq.f32.partialorder %v3475_v23, %v1044_v2  ;;  %1238 = vmin.xlane.f32.xlu0 %v3603_v31  ;;  %v1047_v63 = vpop.xlane.xlu0 %1046 }
 0x4f4   : > { %v1080_v54 = vsel %vm1064_vm15, %v3067_v22, 4  ;;  %vm1065_vm1 = vcmp.eq.f32.partialorder %v3487_v10, %v1047_v63  ;;  %v3615_v60 = vcvt.s32.f32 %v1250_v1 }
 0x4f5   : > { %v3618_v41 = vsel %vm456_vm0, %v1080_v54, 2147483647  ;;  %v1081_v46 = vsel %vm1065_vm1, %v3067_v22, 4  ;;  %v3621_v37 = vcvt.s32.f32 %v1265_v56 }
 0x4f6   : > { %v1280_v58 = vshra.s32 %v3618_v41, 16  ;;  %v3625_v2 = vsel %vm456_vm0, %v1081_v46, 2147483647  ;;  %1253 = vmin.xlane.f32.xlu1 %v3615_v60  ;;  %v1050_v23 = vpop.xlane.xlu1 %1049 }
 0x4f7   : > { %v1295_v14 = vshra.s32 %v3625_v2, 16  ;;  %vm1066_vm2 = vcmp.eq.f32.partialorder %v3497_v45, %v1050_v23  ;;  %1268 = vmin.xlane.f32.xlu0 %v3621_v37  ;;  %v1084_v23 = vand.u32 65535, %v3504_v62 }
 0x4f8   : > { %v1082_v1 = vsel %vm1066_vm2, %v3067_v22, 4  ;;  %v3632_v63 = vcvt.s32.f32 %v1280_v58  ;;  %v1114_v58 = vand.u32 65535, %v3514_v18  ;;  %v1144_v18 = vand.u32 65535, %v3536_v20 }
 0x4f9   : > { %v3635_v56 = vsel %vm456_vm0, %v1082_v1, 2147483647  ;;  %v3637_v54 = vcvt.s32.f32 %v1295_v14  ;;  %v1086_v1 = vcvt.s32.f32 %v1084_v23  ;;  %v1099_v14 = vand.u32 65535, %v3517_v29 }
 0x4fa   : > { %v1310_v46 = vshra.s32 %v3635_v56, 16  ;;  %1283 = vmin.xlane.f32.xlu1 %v3632_v63  ;;  %v1146_v20 = vcvt.s32.f32 %v1144_v18 }
 0x4fb   : > { %1298 = vmin.xlane.f32.xlu0 %v3637_v54  ;;  %v1101_v62 = vcvt.s32.f32 %v1099_v14  ;;  %v1189_v14 = vand.u32 65535, %v3564_v6  ;;  %v1219_v6 = vand.u32 65535, %v3582_v28  ;;  %v1249_v28 = vand.u32 65535, %v3600_v16 }
 0x4fc   : > { %v3642_v10 = vcvt.s32.f32 %v1310_v46  ;;  %v1116_v46 = vcvt.s32.f32 %v1114_v58  ;;  %v1174_v58 = vand.u32 65535, %v3553_v17  ;;  %v1204_v17 = vand.u32 65535, %v3571_v57 }
 0x4fd   : > { %v1234_v57 = vand.u32 65535, %v3589_v4  ;;  %v1264_v4 = vand.u32 65535, %v3607_v34  ;;  %v1279_v16 = vand.u32 65535, %v3618_v41  ;;  %v1294_v34 = vand.u32 65535, %v3625_v2 }
 0x4fe   : > { %1313 = vmin.xlane.f32.xlu1 %v3642_v10  ;;  %v1309_v2 = vand.u32 65535, %v3635_v56 }
 0x500   : > { %v1311_v56 = vcvt.s32.f32 %v1309_v2 }
 0x56a   : > { %v3647_v45 = vpop.xlane.xlu0 %1088 }
 0x56b   : > { %vm1090_vm15 = vcmp.eq.f32.partialorder %v3510_v61, %v3647_v45 }
 0x56c   : > { %v1091_v26 = vsel %vm1090_vm15, %v1086_v1, inf }
 0x56d   : > { %1092 = vmin.xlane.f32.xlu0 %v1091_v26  ;;  %v1159_v26 = vand.u32 65535, %v3546_v11 }
 0x56e   : > { %v3652_v53 = vpop.xlane.xlu0 %1118 }
 0x56f   : > { %v3655_v49 = vpop.xlane.xlu1 %1103  ;;  %vm1120_vm1 = vcmp.eq.f32.partialorder %v3523_v24, %v3652_v53  ;;  %v1161_v27 = vcvt.s32.f32 %v1159_v26 }
 0x570   : > { %vm1105_vm2 = vcmp.eq.f32.partialorder %v3527_v40, %v3655_v49  ;;  %v1121_v29 = vsel %vm1120_vm1, %v1116_v46, inf  ;;  %v1176_v46 = vcvt.s32.f32 %v1174_v58  ;;  %v1221_v58 = vcvt.s32.f32 %v1219_v6 }
 0x571   : > { %v1106_v61 = vsel %vm1105_vm2, %v1101_v62, inf  ;;  %1122 = vmin.xlane.f32.xlu0 %v1121_v29  ;;  %v1191_v29 = vcvt.s32.f32 %v1189_v14  ;;  %v1251_v14 = vcvt.s32.f32 %v1249_v28 }
 0x572   : > { %1107 = vmin.xlane.f32.xlu1 %v1106_v61  ;;  %v1206_v61 = vcvt.s32.f32 %v1204_v17 }
 0x573   : > { %v3663_v23 = vpop.xlane.xlu1 %1133 }
 0x574   : > { %vm1135_vm15 = vcmp.eq.f32.partialorder %v3543_v35, %v3663_v23  ;;  %v3668_v24 = vpop.xlane.xlu0 %1148 }
 0x575   : > { %vm1150_vm14 = vcmp.eq.f32.partialorder %v3549_v19, %v3668_v24  ;;  %v1136_v40 = vsel %vm1135_vm15, %v1131_v48, inf }
 0x576   : > { %1137 = vmin.xlane.f32.xlu1 %v1136_v40  ;;  %v1151_v1 = vsel %vm1150_vm14, %v1146_v20, inf  ;;  %v1236_v20 = vcvt.s32.f32 %v1234_v57 }
 0x577   : > { %1152 = vmin.xlane.f32.xlu0 %v1151_v1  ;;  %v3673_v11 = vpop.xlane.xlu1 %1163 }
 0x578   : > { %vm1165_vm1 = vcmp.eq.f32.partialorder %v3561_v3, %v3673_v11  ;;  %v3678_v35 = vpop.xlane.xlu0 %1178 }
 0x579   : > { %vm1180_vm2 = vcmp.eq.f32.partialorder %v3567_v15, %v3678_v35  ;;  %v1166_v19 = vsel %vm1165_vm1, %v1161_v27, inf  ;;  %v1266_v27 = vcvt.s32.f32 %v1264_v4 }
 0x57a   : > { %1167 = vmin.xlane.f32.xlu1 %v1166_v19  ;;  %v1181_v62 = vsel %vm1180_vm2, %v1176_v46, inf  ;;  %v1281_v46 = vcvt.s32.f32 %v1279_v16 }
 0x57b   : > { %1182 = vmin.xlane.f32.xlu0 %v1181_v62  ;;  %v3683_v18 = vpop.xlane.xlu1 %1193  ;;  %v1296_v62 = vcvt.s32.f32 %v1294_v34 }
 0x57c   : > { %vm1195_vm14 = vcmp.eq.f32.partialorder %v3579_v0, %v3683_v18  ;;  %v3688_v3 = vpop.xlane.xlu0 %1208 }
 0x57d   : > { %vm1210_vm15 = vcmp.eq.f32.partialorder %v3585_v8, %v3688_v3  ;;  %v1196_v15 = vsel %vm1195_vm14, %v1191_v29, inf }
 0x57e   : > { %1197 = vmin.xlane.f32.xlu1 %v1196_v15  ;;  %v1211_v26 = vsel %vm1210_vm15, %v1206_v61, inf  ;;  %vm1420_vm15 = vcmask 1043456  }
 0x57f   : > { %1212 = vmin.xlane.f32.xlu0 %v1211_v26  ;;  %v3693_v48 = vpop.xlane.xlu1 %1223  ;;  %v1125_v26 = vcvt.f32.s32 %v3652_v53 }
 0x580   : > { %vm1225_vm1 = vcmp.eq.f32.partialorder %v3597_v21, %v3693_v48  ;;  %v3698_v0 = vpop.xlane.xlu0 %1238 }
 0x581   : > { %vm1240_vm2 = vcmp.eq.f32.partialorder %v3603_v31, %v3698_v0  ;;  %v1226_v8 = vsel %vm1225_vm1, %v1221_v58, inf  ;;  %v1371_v31 = vld [vmem:[%s3992_s3] sm:$0xf] }
 0x582   : > { %1227 = vmin.xlane.f32.xlu1 %v1226_v8  ;;  %v1241_v40 = vsel %vm1240_vm2, %v1236_v20, inf  ;;  %2170 = vmatprep.subr.msk.mxu1 %vm1420_vm15, %v1371_v31  ;;  %v971_v20 = vsel %vm955_vm3, %v2988_v25, 0.0  ;;  %v1126_v8 = vshll.u32 %v1125_v26, 16  ;;  %v972_v25 = vsel %vm956_vm5, %v2996_v36, 0.0 }
 0x583   : > { %1242 = vmin.xlane.f32.xlu0 %v1241_v40  ;;  %v3703_v1 = vpop.xlane.xlu1 %1253  ;;  %2171 = vmatpush3.msk.msra.mxu1 %vm1420_vm15, %v1371_v31  ;;  %v1185_v36 = vcvt.f32.s32 %v3678_v35 }
 0x584   : > { %vm1255_vm14 = vcmp.eq.f32.partialorder %v3615_v60, %v3703_v1  ;;  %v3708_v21 = vpop.xlane.xlu0 %1268 }
 0x585   : > { %vm1270_vm1 = vcmp.eq.f32.partialorder %v3621_v37, %v3708_v21  ;;  %v1256_v41 = vsel %vm1255_vm14, %v1251_v14, inf  ;;  %v1186_v47 = vshll.u32 %v1185_v36, 16 }
 0x586   : > { %1257 = vmin.xlane.f32.xlu1 %v1256_v41  ;;  %v1271_v17 = vsel %vm1270_vm1, %v1266_v27, inf }
 0x587   : > { %1272 = vmin.xlane.f32.xlu0 %v1271_v17  ;;  %v3716_v60 = vpop.xlane.xlu1 %1283 }
 0x588   : > { %vm1285_vm2 = vcmp.eq.f32.partialorder %v3632_v63, %v3716_v60  ;;  %v3720_v19 = vpop.xlane.xlu0 %1298  ;;  %v1095_v63 = vcvt.f32.s32 %v3647_v45 }
 0x589   : > { %vm1300_vm13 = vcmp.eq.f32.partialorder %v3637_v54, %v3720_v19  ;;  %v1286_v37 = vsel %vm1285_vm2, %v1281_v46, inf  ;;  %v1110_v54 = vcvt.f32.s32 %v3655_v49  ;;  %v1155_v49 = vcvt.f32.s32 %v3668_v24 }
 0x58a   : > { %1287 = vmin.xlane.f32.xlu1 %v1286_v37  ;;  %v1301_v6 = vsel %vm1300_vm13, %v1296_v62, inf  ;;  %v1096_v15 = vshll.u32 %v1095_v63, 16  ;;  %v1170_v24 = vcvt.f32.s32 %v3673_v11  ;;  %v1200_v11 = vcvt.f32.s32 %v3683_v18 }
 0x58b   : > { %1302 = vmin.xlane.f32.xlu0 %v1301_v6  ;;  %v3724_v29 = vpop.xlane.xlu1 %1313  ;;  %v1111_v45 = vshll.u32 %v1110_v54, 16  ;;  %v1156_v2 = vshll.u32 %v1155_v49, 16  ;;  %v1215_v37 = vcvt.f32.s32 %v3688_v3  ;;  %v976_v3 = vsel %vm960_vm8, %v3013_v39, 0.0 }
 0x58c   : > { %vm1315_vm14 = vcmp.eq.f32.partialorder %v3642_v10, %v3724_v29  ;;  %v1140_v10 = vcvt.f32.s32 %v3663_v23  ;;  %v973_v23 = vsel %vm957_vm4, %v2993_v33, 0.0  ;;  %v1171_v62 = vshll.u32 %v1170_v24, 16  ;;  %v4078_v24 = vld [vmem:[#allocation18_spill] sm:$0xff] }
 0x58d   : > { %v1316_v57 = vsel %vm1315_vm14, %v1311_v56, inf  ;;  %v1201_v63 = vshll.u32 %v1200_v11, 16  ;;  %v1245_v39 = vcvt.f32.s32 %v3698_v0  ;;  %v4095_v0 = vld [vmem:[#allocation37_spill] sm:$0xff] }
 0x58e   : > { %1317 = vmin.xlane.f32.xlu1 %v1316_v57  ;;  %v1141_v27 = vshll.u32 %v1140_v10, 16  ;;  %v977_v57 = vsel %vm961_vm9, %v3016_v42, 0.0  ;;  %v1260_v10 = vcvt.f32.s32 %v3703_v1 }
 0x5fa   : > { %v1093_v61 = vpop.xlane.xlu0 %1092 }
 0x5fb   : > { %v1094_v28 = vcvt.f32.s32 %v1093_v61 }
 0x5fd   : > { %v1097_v58 = vadd.s32 %v1096_v15, %v1094_v28  ;;  %v1216_v15 = vshll.u32 %v1215_v37, 16  ;;  %v4082_v37 = vld [vmem:[#allocation32_spill] sm:$0xff] }
 0x5fe   : > { %v1123_v4 = vpop.xlane.xlu0 %1122 }
 0x5ff   : > { %v1108_v40 = vpop.xlane.xlu1 %1107  ;;  %v1124_v16 = vcvt.f32.s32 %v1123_v4  ;;  %vm1323_vm13 = vcmp.eq.s32.totalorder %v3067_v22, %v1097_v58  ;;  %v4070_v58 = vld [vmem:[#allocation15_spill] sm:$0xff] }
 0x600   : > { %v1109_v14 = vcvt.f32.s32 %v1108_v40  ;;  %v1339_v53 = vsel %vm1323_vm13, %v3306_v55, %v971_v20  ;;  %v978_v4 = vsel %vm962_vm10, %v4070_v58, 0.0  ;;  %v4072_v20 = vld [vmem:[#allocation16_spill] sm:$0xff] }
 0x601   : > { %v1127_v34 = vadd.s32 %v1126_v8, %v1124_v16  ;;  %1355 = vst.msk [vmem:[#allocation2] sm:$0xff] %vm456_vm0, %v1339_v53  ;;  %2172 = vmatprep.mubr.msk.f32.mxu1 %vm456_vm0, %v1339_v53  ;;  %v979_v8 = vsel %vm963_vm11, %v4072_v20, 0.0  ;;  %v1246_v53 = vshll.u32 %v1245_v39, 16  ;;  %v4090_v39 = vld [vmem:[#allocation36_spill] sm:$0xff]  ;;  %v4094_v20 = vld [vmem:[#allocation22_spill] sm:$0xff] }
 0x602   : > { %v1112_v7 = vadd.s32 %v1111_v45, %v1109_v14 }
 0x603   : > { %vm1325_vm3 = vcmp.eq.s32.totalorder %v3067_v22, %v1127_v34  ;;  %v1138_v55 = vpop.xlane.xlu1 %1137  ;;  %v4074_v34 = vld [vmem:[#allocation26_spill] sm:$0xff] }
 0x604   : > { %vm1324_vm15 = vcmp.eq.s32.totalorder %v3067_v22, %v1112_v7  ;;  %v1139_v31 = vcvt.f32.s32 %v1138_v55  ;;  %v1153_v41 = vpop.xlane.xlu0 %1152  ;;  %v1341_v17 = vsel %vm1325_vm3, %v3323_v38, %v973_v23  ;;  %v975_v38 = vsel %vm959_vm7, %v3006_v32, 0.0 }
 0x605   : > { %v1154_v12 = vcvt.f32.s32 %v1153_v41  ;;  %v1340_v46 = vsel %vm1324_vm15, %v3330_v44, %v972_v25  ;;  %1357 = vst.msk [vmem:[#allocation2 + $0x10] sm:$0xff] %vm456_vm0, %v1341_v17  ;;  %v4075_v25 = vld [vmem:[#allocation28_spill] sm:$0xff] }
 0x606   : > { %v1142_v33 = vadd.s32 %v1141_v27, %v1139_v31  ;;  %1356 = vst.msk [vmem:[#allocation2 + $0x8] sm:$0xff] %vm456_vm0, %v1340_v46  ;;  %2173 = vmatmul.mubr.msk.f32.vlgmr.msra.gmra.mrb[0].mxu1 %vm456_vm0, %v1340_v46  ;;  %v4076_v27 = vld [vmem:[#allocation17_spill] sm:$0xff]  ;;  %v1290_v46 = vcvt.f32.s32 %v3716_v60  ;;  %v4084_v60 = vld [vmem:[#allocation31_spill] sm:$0xff] }
 0x607   : > { %v1157_v44 = vadd.s32 %v1156_v2, %v1154_v12  ;;  %v1168_v35 = vpop.xlane.xlu1 %1167  ;;  %2175 = vmatprep.mubr.msk.f32.mxu1 %vm456_vm0, %v1341_v17  ;;  %v980_v55 = vsel %vm964_vm12, %v4076_v27, 0.0  ;;  %v4079_v31 = vld [vmem:[#allocation29_spill] sm:$0xff]  ;;  %v1261_v17 = vshll.u32 %v1260_v10, 16  ;;  %vm4085_vm1 = vcmp.eq.s32.totalorder %v3067_v22, %v4084_v60  ;;  %v4097_v10 = vld [vmem:[#allocation38_spill] sm:$0xff] }
 0x608   : > { %vm1326_vm4 = vcmp.eq.s32.totalorder %v3067_v22, %v1142_v33  ;;  %v1169_v6 = vcvt.f32.s32 %v1168_v35  ;;  %v1183_v56 = vpop.xlane.xlu0 %1182  ;;  %vm4080_vm10 = vcmp.eq.s32.totalorder %v3067_v22, %v4079_v31 }
 0x609   : > { %vm1327_vm5 = vcmp.eq.s32.totalorder %v3067_v22, %v1157_v44  ;;  %v1184_v43 = vcvt.f32.s32 %v1183_v56  ;;  %v1342_v50 = vsel %vm1326_vm4, %v3348_v59, %v974_v13  ;;  %v981_v41 = vsel %vm4080_vm10, %v4078_v24, 0.0  ;;  %v4081_v44 = vld [vmem:[#allocation30_spill] sm:$0xff]  ;;  %v4083_v56 = vld [vmem:[#allocation19_spill] sm:$0xff] }
 0x60a   : > { %v1172_v32 = vadd.s32 %v1171_v62, %v1169_v6  ;;  %1358 = vst.msk [vmem:[#allocation2 + $0x18] sm:$0xff] %vm456_vm0, %v1342_v50  ;;  %2176 = vmatmul.mubr.msk.f32.gmra.mrb[2].mxu1 %vm456_vm0, %v1342_v50  ;;  %v1343_v18 = vsel %vm1327_vm5, %v3360_v52, %v975_v38  ;;  %v1230_v52 = vcvt.f32.s32 %v3693_v48  ;;  %v1305_v38 = vcvt.f32.s32 %v3720_v19  ;;  %v4087_v19 = vld [vmem:[#allocation33_spill] sm:$0xff] }
 0x60b   : > { %v1187_v61 = vadd.s32 %v1186_v47, %v1184_v43  ;;  %v1198_v59 = vpop.xlane.xlu1 %1197  ;;  %1359 = vst.msk [vmem:[#allocation2 + $0x20] sm:$0xff] %vm456_vm0, %v1343_v18  ;;  %2178 = vmatprep.mubr.msk.f32.mxu1 %vm456_vm0, %v1343_v18  ;;  %v982_v47 = vsel %vm4085_vm1, %v4083_v56, 0.0  ;;  %v4086_v43 = vld [vmem:[#allocation20_spill] sm:$0xff]  ;;  %vm4088_vm2 = vcmp.eq.s32.totalorder %v3067_v22, %v4087_v19  ;;  %vm4096_vm4 = vcmp.eq.s32.totalorder %v3067_v22, %v4095_v0 }
 0x60c   : > { %vm1328_vm6 = vcmp.eq.s32.totalorder %v3067_v22, %v1172_v32  ;;  %v1199_v26 = vcvt.f32.s32 %v1198_v59  ;;  %v1213_v51 = vpop.xlane.xlu0 %1212  ;;  %v1231_v16 = vshll.u32 %v1230_v52, 16  ;;  %v983_v50 = vsel %vm4088_vm2, %v4086_v43, 0.0  ;;  %v4089_v52 = vld [vmem:[#allocation34_spill] sm:$0xff] }
 0x60d   : > { %vm1329_vm7 = vcmp.eq.s32.totalorder %v3067_v22, %v1187_v61  ;;  %v1214_v5 = vcvt.f32.s32 %v1213_v51  ;;  %v1344_v42 = vsel %vm1328_vm6, %v3374_v9, %v976_v3  ;;  %v1291_v3 = vshll.u32 %v1290_v46, 16 }
 0x60e   : > { %v1202_v28 = vadd.s32 %v1201_v63, %v1199_v26  ;;  %1360 = vst.msk [vmem:[#allocation2 + $0x28] sm:$0xff] %vm456_vm0, %v1344_v42  ;;  %2179 = vmatmul.mubr.msk.f32.gmra.mrb[4].mxu1 %vm456_vm0, %v1344_v42  ;;  %v1345_v54 = vsel %vm1329_vm7, %v3386_v30, %v977_v57  ;;  %v1275_v30 = vcvt.f32.s32 %v3708_v21  ;;  %v1320_v57 = vcvt.f32.s32 %v3724_v29  ;;  %v4091_v29 = vld [vmem:[#allocation21_spill] sm:$0xff] }
 0x60f   : > { %v1217_v9 = vadd.s32 %v1216_v15, %v1214_v5  ;;  %v1228_v40 = vpop.xlane.xlu1 %1227  ;;  %1361 = vst.msk [vmem:[#allocation2 + $0x30] sm:$0xff] %vm456_vm0, %v1345_v54  ;;  %2181 = vmatprep.mubr.msk.f32.mxu1 %vm456_vm0, %v1345_v54  ;;  %v1306_v59 = vshll.u32 %v1305_v38, 16  ;;  %v4092_v54 = vld [vmem:[#allocation35_spill] sm:$0xff] }
 0x610   : > { %vm1330_vm8 = vcmp.eq.s32.totalorder %v3067_v22, %v1202_v28  ;;  %v1229_v45 = vcvt.f32.s32 %v1228_v40  ;;  %v1243_v14 = vpop.xlane.xlu0 %1242  ;;  %v1276_v12 = vshll.u32 %v1275_v30, 16  ;;  %vm4093_vm3 = vcmp.eq.s32.totalorder %v3067_v22, %v4092_v54 }
 0x611   : > { %vm1331_vm9 = vcmp.eq.s32.totalorder %v3067_v22, %v1217_v9  ;;  %v1244_v49 = vcvt.f32.s32 %v1243_v14  ;;  %v1346_v7 = vsel %vm1330_vm8, %v4074_v34, %v978_v4  ;;  %v984_v58 = vsel %vm4093_vm3, %v4091_v29, 0.0  ;;  %v4100_v14 = vld [vmem:[#allocation39_spill] sm:$0xff] }
 0x612   : > { %v1232_v1 = vadd.s32 %v1231_v16, %v1229_v45  ;;  %1362 = vst.msk [vmem:[#allocation2 + $0x38] sm:$0xff] %vm456_vm0, %v1346_v7  ;;  %2182 = vmatmul.mubr.msk.f32.gmra.mrb[6].mxu1 %vm456_vm0, %v1346_v7  ;;  %v1347_v23 = vsel %vm1331_vm9, %v4075_v25, %v979_v8  ;;  %v1321_v48 = vshll.u32 %v1320_v57, 16  ;;  %v985_v8 = vsel %vm4096_vm4, %v4094_v20, 0.0  ;;  %v4098_v16 = vld [vmem:[#allocation40_spill] sm:$0xff]  ;;  %v4099_v45 = vld [vmem:[#allocation23_spill] sm:$0xff] }
 0x613   : > { %v1247_v2 = vadd.s32 %v1246_v53, %v1244_v49  ;;  %v1258_v36 = vpop.xlane.xlu1 %1257  ;;  %1363 = vst.msk [vmem:[#allocation2 + $0x40] sm:$0xff] %vm456_vm0, %v1347_v23  ;;  %2184 = vmatprep.mubr.msk.f32.mxu1 %vm456_vm0, %v1347_v23  ;;  %vm4101_vm6 = vcmp.eq.s32.totalorder %v3067_v22, %v4100_v14  ;;  %v4102_v49 = vld [vmem:[#allocation41_spill] sm:$0xff] }
 0x614   : > { %vm1332_vm11 = vcmp.eq.s32.totalorder %v3067_v22, %v1232_v1  ;;  %v1259_v33 = vcvt.f32.s32 %v1258_v36  ;;  %v1273_v13 = vpop.xlane.xlu0 %1272  ;;  %v986_v53 = vsel %vm4101_vm6, %v4099_v45, 0.0 }
 0x615   : > { %vm1333_vm12 = vcmp.eq.s32.totalorder %v3067_v22, %v1247_v2  ;;  %v1274_v11 = vcvt.f32.s32 %v1273_v13  ;;  %v1348_v35 = vsel %vm1332_vm11, %v4081_v44, %v980_v55 }
 0x616   : > { %v1262_v62 = vadd.s32 %v1261_v17, %v1259_v33  ;;  %1364 = vst.msk [vmem:[#allocation2 + $0x48] sm:$0xff] %vm456_vm0, %v1348_v35  ;;  %2185 = vmatmul.mubr.msk.f32.gmra.mrb[8].mxu1 %vm456_vm0, %v1348_v35  ;;  %v1349_v6 = vsel %vm1333_vm12, %v4082_v37, %v981_v41 }
 0x617   : > { %v1277_v32 = vadd.s32 %v1276_v12, %v1274_v11  ;;  %v1288_v18 = vpop.xlane.xlu1 %1287  ;;  %1365 = vst.msk [vmem:[#allocation2 + $0x50] sm:$0xff] %vm456_vm0, %v1349_v6  ;;  %2187 = vmatprep.mubr.msk.f32.mxu1 %vm456_vm0, %v1349_v6 }
 0x618   : > { %vm1334_vm14 = vcmp.eq.s32.totalorder %v3067_v22, %v1262_v62  ;;  %v1289_v63 = vcvt.f32.s32 %v1288_v18  ;;  %v1303_v61 = vpop.xlane.xlu0 %1302 }
 0x619   : > { %vm1335_vm13 = vcmp.eq.s32.totalorder %v3067_v22, %v1277_v32  ;;  %v1304_v15 = vcvt.f32.s32 %v1303_v61  ;;  %v1350_v26 = vsel %vm1334_vm14, %v4089_v52, %v982_v47 }
 0x61a   : > { %v1292_v51 = vadd.s32 %v1291_v3, %v1289_v63  ;;  %1366 = vst.msk [vmem:[#allocation2 + $0x58] sm:$0xff] %vm456_vm0, %v1350_v26  ;;  %2188 = vmatmul.mubr.msk.f32.gmra.mrb[10].mxu1 %vm456_vm0, %v1350_v26  ;;  %v1351_v5 = vsel %vm1335_vm13, %v4090_v39, %v983_v50 }
 0x61b   : > { %v1307_v42 = vadd.s32 %v1306_v59, %v1304_v15  ;;  %v1318_v28 = vpop.xlane.xlu1 %1317  ;;  %1367 = vst.msk [vmem:[#allocation2 + $0x60] sm:$0xff] %vm456_vm0, %v1351_v5  ;;  %2190 = vmatprep.mubr.msk.f32.mxu1 %vm456_vm0, %v1351_v5 }
 0x61c   : > { %vm1336_vm15 = vcmp.eq.s32.totalorder %v3067_v22, %v1292_v51  ;;  %v1319_v4 = vcvt.f32.s32 %v1318_v28 }
 0x61d   : > { %vm1337_vm5 = vcmp.eq.s32.totalorder %v3067_v22, %v1307_v42  ;;  %v1352_v9 = vsel %vm1336_vm15, %v4097_v10, %v984_v58 }
 0x61e   : > { %v1322_v40 = vadd.s32 %v1321_v48, %v1319_v4  ;;  %1368 = vst.msk [vmem:[#allocation2 + $0x68] sm:$0xff] %vm456_vm0, %v1352_v9  ;;  %2191 = vmatmul.mubr.msk.f32.gmra.mrb[12].mxu1 %vm456_vm0, %v1352_v9  ;;  %v1353_v30 = vsel %vm1337_vm5, %v4098_v16, %v985_v8 }
 0x61f   : > { %1369 = vst.msk [vmem:[#allocation2 + $0x70] sm:$0xff] %vm456_vm0, %v1353_v30  ;;  %2193 = vmatprep.mubr.msk.f32.mxu1 %vm456_vm0, %v1353_v30 }
 0x620   : > { %vm1338_vm7 = vcmp.eq.s32.totalorder %v3067_v22, %v1322_v40 }
 0x621   : > { %v1354_v34 = vsel %vm1338_vm7, %v4102_v49, %v986_v53 }
 0x622   : > { %1370 = vst.msk [vmem:[#allocation2 + $0x78] sm:$0xff] %vm456_vm0, %v1354_v34  ;;  %2194 = vmatmul.mubr.msk.f32.gmra.mrb[14].mxu1 %vm456_vm0, %v1354_v34 }
 0x6d9   : > { %v2174_v7 = vpop.f32.mrb[0].mxu1 }
 0x6da   : > { %1570 = vst [vmem:[#allocation3 + $0x8] sm:$0xff] %v2174_v7  ;;  %v1490_v1 = vpop.f32.mrb[1].mxu1 }
 0x6db   : > { %1569 = vst [vmem:[#allocation3] sm:$0xff] %v1490_v1 }
 0x6dd   : > { %v2177_v25 = vpop.f32.mrb[2].mxu1 }
 0x6de   : > { %1572 = vst [vmem:[#allocation3 + $0x18] sm:$0xff] %v2177_v25  ;;  %v1500_v23 = vpop.f32.mrb[3].mxu1 }
 0x6df   : > { %1571 = vst [vmem:[#allocation3 + $0x10] sm:$0xff] %v1500_v23 }
 0x6e1   : > { %v2180_v27 = vpop.f32.mrb[4].mxu1 }
 0x6e2   : > { %1574 = vst [vmem:[#allocation3 + $0x28] sm:$0xff] %v2180_v27  ;;  %v1510_v21 = vpop.f32.mrb[5].mxu1 }
 0x6e3   : > { %1573 = vst [vmem:[#allocation3 + $0x20] sm:$0xff] %v1510_v21 }
 0x6e5   : > { %v2183_v55 = vpop.f32.mrb[6].mxu1 }
 0x6e6   : > { %1576 = vst [vmem:[#allocation3 + $0x38] sm:$0xff] %v2183_v55  ;;  %v1520_v22 = vpop.f32.mrb[7].mxu1 }
 0x6e7   : > { %1575 = vst [vmem:[#allocation3 + $0x30] sm:$0xff] %v1520_v22 }
 0x6e9   : > { %v2186_v24 = vpop.f32.mrb[8].mxu1 }
 0x6ea   : > { %1578 = vst [vmem:[#allocation3 + $0x48] sm:$0xff] %v2186_v24  ;;  %v1530_v31 = vpop.f32.mrb[9].mxu1 }
 0x6eb   : > { %1577 = vst [vmem:[#allocation3 + $0x40] sm:$0xff] %v1530_v31 }
 0x6ed   : > { %v2189_v41 = vpop.f32.mrb[10].mxu1 }
 0x6ee   : > { %1580 = vst [vmem:[#allocation3 + $0x58] sm:$0xff] %v2189_v41  ;;  %v1540_v17 = vpop.f32.mrb[11].mxu1 }
 0x6ef   : > { %1579 = vst [vmem:[#allocation3 + $0x50] sm:$0xff] %v1540_v17 }
 0x6f1   : > { %v2192_v2 = vpop.f32.mrb[12].mxu1 }
 0x6f2   : > { %1582 = vst [vmem:[#allocation3 + $0x68] sm:$0xff] %v2192_v2  ;;  %v1550_v36 = vpop.f32.mrb[13].mxu1 }
 0x6f3   : > { %1581 = vst [vmem:[#allocation3 + $0x60] sm:$0xff] %v1550_v36 }
 0x6f5   : > { %v2195_v12 = vpop.f32.mrb[14].mxu1 }
 0x6f6   : > { %1584 = vst [vmem:[#allocation3 + $0x78] sm:$0xff] %v2195_v12  ;;  %v1560_v46 = vpop.f32.mrb[15].mxu1 }
 0x6f7   : > { %1583 = vst [vmem:[#allocation3 + $0x70] sm:$0xff] %v1560_v46 }
 0x6f8 PF: > { %v1686_v33 = vld [vmem:[%s2833_s12] sm:$0xff]  ;;  %v1687_v13 = vld [vmem:[%s2833_s12 + $0x8] sm:$0xff]  ;;  %v1688_v38 = vld [vmem:[%s2833_s12 + $0x10] sm:$0xff]  ;;  %v1585_v11 = vlaneseq  ;;  %v1587_v60 = vstv %s2617_s21  ;;  %vm1621_vm8 = vcmask 31744   ;;  %p2072_p11 = scmp.ne.s32.totalorder %s2617_s21, 3 }
 0x6f9   : > { %v2252_v44 = vpack.c.bf16 %v1687_v13, %v1686_v33  ;;  %v1689_v35 = vld [vmem:[%s2833_s12 + $0x18] sm:$0xff]  ;;  %v1690_v47 = vld [vmem:[%s2833_s12 + $0x20] sm:$0xff]  ;;  %v1691_v43 = vld [vmem:[%s2833_s12 + $0x28] sm:$0xff] }
 0x6fa   : > { %v2256_v62 = vpack.c.bf16 %v1689_v35, %v1688_v38  ;;  %v1586_v37 = vand.u32 127, %v1585_v11  ;;  %v1670_v6 = vld [vmem:[#allocation4] sm:$0xff]  ;;  %v2260_v50 = vpack.c.bf16 %v1691_v43, %v1690_v47  ;;  %v1591_v32 = vld [vmem:[#allocation2 + $0x10] sm:$0xff]  ;;  %v1592_v57 = vld [vmem:[#allocation2 + $0x18] sm:$0xff] }
 0x6fb   : > { %2253 = vmatprep.subr.bf16.mxu0 %v2252_v44  ;;  %2284 = vmatprep.subr.bf16.mxu1 %v2252_v44  ;;  %v1678_v56 = vld [vmem:[#allocation4 + $0x40] sm:$0xff]  ;;  %v1590_v63 = vld [vmem:[#allocation2 + $0x8] sm:$0xff]  ;;  %v1692_v5 = vld [vmem:[%s2833_s12 + $0x30] sm:$0xff] }
 0x6fc   : > { %2255 = vmatpush3.bf16.xpose.msra.mxu0 %v2252_v44  ;;  %2292 = vmatpush3.bf16.xpose.msra.mxu1 %v2252_v44  ;;  %vm3879_vm0 = vcmp.eq.s32.totalorder %v1586_v37, %v1587_v60  ;;  %v1589_v3 = vld [vmem:[#allocation2] sm:$0xff]  ;;  %v1594_v51 = vld [vmem:[#allocation2 + $0x28] sm:$0xff]  ;;  %v1596_v4 = vld [vmem:[#allocation2 + $0x38] sm:$0xff] }
 0x6fd   : > { %2257 = vmatprep.subr.bf16.mxu0 %v2256_v62  ;;  %2285 = vmatprep.subr.bf16.mxu1 %v2256_v62  ;;  %v1607_v18 = vsel %vm3879_vm0, %v1591_v32, 0.0  ;;  %v1605_v59 = vsel %vm3879_vm0, %v1589_v3, 0.0  ;;  %v1608_v15 = vsel %vm3879_vm0, %v1592_v57, 0.0  ;;  %v1606_v52 = vsel %vm3879_vm0, %v1590_v63, 0.0  ;;  %v1593_v39 = vld [vmem:[#allocation2 + $0x20] sm:$0xff]  ;;  %v1595_v20 = vld [vmem:[#allocation2 + $0x30] sm:$0xff] }
 0x6fe   : > { %2228 = vmatprep.mubr.f32.mxu0 %v1670_v6  ;;  %2240 = vmatprep.mubr.f32.mxu1 %v1678_v56  ;;  %v1628_v61 = vsel %vm1621_vm8, %v1607_v18, 0.0  ;;  %v1622_v26 = vsel %vm1621_vm8, %v1605_v59, 0.0  ;;  %v1693_v42 = vld [vmem:[%s2833_s12 + $0x38] sm:$0xff]  ;;  %v1631_v28 = vsel %vm1621_vm8, %v1608_v15, 0.0  ;;  %v1625_v29 = vsel %vm1621_vm8, %v1606_v52, 0.0  ;;  %v1598_v40 = vld [vmem:[#allocation2 + $0x48] sm:$0xff] }
 0x6ff   : > { %1629 = vadd.xlane.f32.xlu1 %v1628_v61  ;;  %1623 = vadd.xlane.f32.xlu0 %v1622_v26  ;;  %v1610_v54 = vsel %vm3879_vm0, %v1594_v51, 0.0  ;;  %v1609_v58 = vsel %vm3879_vm0, %v1593_v39, 0.0  ;;  %v2264_v48 = vpack.c.bf16 %v1693_v42, %v1692_v5  ;;  %v1612_v10 = vsel %vm3879_vm0, %v1596_v4, 0.0  ;;  %v1597_v16 = vld [vmem:[#allocation2 + $0x40] sm:$0xff]  ;;  %v1695_v45 = vld [vmem:[%s2833_s12 + $0x48] sm:$0xff]  ;;  %v1600_v1 = vld [vmem:[#allocation2 + $0x58] sm:$0xff] }
 0x700   : > { %v1637_v0 = vsel %vm1621_vm8, %v1610_v54, 0.0  ;;  %v1634_v8 = vsel %vm1621_vm8, %v1609_v58, 0.0  ;;  %v1611_v9 = vsel %vm3879_vm0, %v1595_v20, 0.0  ;;  %v1694_v30 = vld [vmem:[%s2833_s12 + $0x40] sm:$0xff]  ;;  %v1643_v14 = vsel %vm1621_vm8, %v1612_v10, 0.0  ;;  %v1599_v25 = vld [vmem:[#allocation2 + $0x50] sm:$0xff] }
 0x701   : > { %v1640_v53 = vsel %vm1621_vm8, %v1611_v9, 0.0  ;;  %v1614_v49 = vsel %vm3879_vm0, %v1598_v40, 0.0  ;;  %v1613_v34 = vsel %vm3879_vm0, %v1597_v16, 0.0  ;;  %v2268_v7 = vpack.c.bf16 %v1695_v45, %v1694_v30  ;;  %v1602_v22 = vld [vmem:[#allocation2 + $0x68] sm:$0xff]  ;;  %v1601_v24 = vld [vmem:[#allocation2 + $0x60] sm:$0xff]  ;;  %v1696_v31 = vld [vmem:[%s2833_s12 + $0x50] sm:$0xff] }
 0x702   : > { %v1649_v23 = vsel %vm1621_vm8, %v1614_v49, 0.0  ;;  %v1646_v27 = vsel %vm1621_vm8, %v1613_v34, 0.0  ;;  %v1616_v21 = vsel %vm3879_vm0, %v1600_v1, 0.0  ;;  %v1615_v55 = vsel %vm3879_vm0, %v1599_v25, 0.0  ;;  %v1697_v41 = vld [vmem:[%s2833_s12 + $0x58] sm:$0xff]  ;;  %v1603_v13 = vld [vmem:[#allocation2 + $0x70] sm:$0xff] }
 0x703   : > { %1632 = vadd.xlane.f32.xlu1 %v1631_v28  ;;  %1626 = vadd.xlane.f32.xlu0 %v1625_v29  ;;  %v1655_v17 = vsel %vm1621_vm8, %v1616_v21, 0.0  ;;  %v1652_v2 = vsel %vm1621_vm8, %v1615_v55, 0.0  ;;  %v1618_v36 = vsel %vm3879_vm0, %v1602_v22, 0.0  ;;  %v1617_v12 = vsel %vm3879_vm0, %v1601_v24, 0.0  ;;  %v1604_v33 = vld [vmem:[#allocation2 + $0x78] sm:$0xff]  ;;  %v1699_v37 = vld [vmem:[%s2833_s12 + $0x68] sm:$0xff] }
 0x704   : > { %2259 = vmatpush3.bf16.xpose.msra.mxu0 %v2256_v62  ;;  %2293 = vmatpush3.bf16.xpose.msra.mxu1 %v2256_v62  ;;  %v2272_v46 = vpack.c.bf16 %v1697_v41, %v1696_v31  ;;  %v1661_v38 = vsel %vm1621_vm8, %v1618_v36, 0.0  ;;  %v1658_v11 = vsel %vm1621_vm8, %v1617_v12, 0.0  ;;  %v1620_v44 = vsel %vm3879_vm0, %v1604_v33, 0.0  ;;  %v1698_v62 = vld [vmem:[%s2833_s12 + $0x60] sm:$0xff]  ;;  %v1700_v47 = vld [vmem:[%s2833_s12 + $0x70] sm:$0xff]  ;;  %v1701_v43 = vld [vmem:[%s2833_s12 + $0x78] sm:$0xff] }
 0x705   : > { %2261 = vmatprep.subr.bf16.mxu0 %v2260_v50  ;;  %2286 = vmatprep.subr.bf16.mxu1 %v2260_v50  ;;  %v1619_v35 = vsel %vm3879_vm0, %v1603_v13, 0.0  ;;  %v1667_v6 = vsel %vm1621_vm8, %v1620_v44, 0.0  ;;  %v2276_v60 = vpack.c.bf16 %v1699_v37, %v1698_v62  ;;  %v2280_v19 = vpack.c.bf16 %v1701_v43, %v1700_v47  ;;  %v1679_v32 = vld [vmem:[#allocation4 + $0x48] sm:$0xff]  ;;  %v1672_v18 = vld [vmem:[#allocation4 + $0x10] sm:$0xff]  ;;  %v1673_v57 = vld [vmem:[#allocation4 + $0x18] sm:$0xff] }
 0x706   : > { %v1664_v56 = vsel %vm1621_vm8, %v1619_v35, 0.0  ;;  %v1680_v3 = vld [vmem:[#allocation4 + $0x50] sm:$0xff]  ;;  %v1681_v63 = vld [vmem:[#allocation4 + $0x58] sm:$0xff]  ;;  %v1674_v61 = vld [vmem:[#allocation4 + $0x20] sm:$0xff] }
 0x707   : > { %1638 = vadd.xlane.f32.xlu1 %v1637_v0  ;;  %1635 = vadd.xlane.f32.xlu0 %v1634_v8  ;;  %v1682_v59 = vld [vmem:[#allocation4 + $0x60] sm:$0xff]  ;;  %v1675_v15 = vld [vmem:[#allocation4 + $0x28] sm:$0xff]  ;;  %v1676_v26 = vld [vmem:[#allocation4 + $0x30] sm:$0xff] }
 0x708   : > { %v1683_v52 = vld [vmem:[#allocation4 + $0x68] sm:$0xff]  ;;  %v1684_v51 = vld [vmem:[#allocation4 + $0x70] sm:$0xff]  ;;  %v1677_v39 = vld [vmem:[#allocation4 + $0x38] sm:$0xff] }
 0x709   : > { %v1685_v5 = vld [vmem:[#allocation4 + $0x78] sm:$0xff]  ;;  %v1848_v16 = vld [vmem:[#allocation3 + $0x8] sm:$0xff]  ;;  %v1847_v34 = vld [vmem:[#allocation3] sm:$0xff] }
 0x70a   : > { %v1856_v45 = vld [vmem:[#allocation3 + $0x48] sm:$0xff]  ;;  %v1855_v1 = vld [vmem:[#allocation3 + $0x40] sm:$0xff]  ;;  %v1858_v36 = vld [vmem:[#allocation3 + $0x58] sm:$0xff] }
 0x70b   : > { %1644 = vadd.xlane.f32.xlu1 %v1643_v14  ;;  %1641 = vadd.xlane.f32.xlu0 %v1640_v53  ;;  %v1849_v13 = vld [vmem:[#allocation3 + $0x10] sm:$0xff]  ;;  %v1852_v47 = vld [vmem:[#allocation3 + $0x28] sm:$0xff] }
 0x70c   : > { %2263 = vmatpush3.bf16.xpose.msra.mxu0 %v2260_v50  ;;  %2294 = vmatpush3.bf16.xpose.msra.mxu1 %v2260_v50  ;;  %v1671_v50 = vld [vmem:[#allocation4 + $0x8] sm:$0xff] }
 0x70d   : > { %2265 = vmatprep.subr.bf16.mxu0 %v2264_v48  ;;  %2287 = vmatprep.subr.bf16.mxu1 %v2264_v48 }
 0x70f   : > { %1650 = vadd.xlane.f32.xlu1 %v1649_v23  ;;  %1647 = vadd.xlane.f32.xlu0 %v1646_v27 }
 0x713   : > { %1656 = vadd.xlane.f32.xlu1 %v1655_v17  ;;  %1653 = vadd.xlane.f32.xlu0 %v1652_v2  ;;  %v1850_v17 = vld [vmem:[#allocation3 + $0x18] sm:$0xff] }
 0x714   : > { %2267 = vmatpush3.bf16.xpose.msra.mxu0 %v2264_v48  ;;  %2295 = vmatpush3.bf16.xpose.msra.mxu1 %v2264_v48 }
 0x715   : > { %2269 = vmatprep.subr.bf16.mxu0 %v2268_v7  ;;  %2288 = vmatprep.subr.bf16.mxu1 %v2268_v7 }
 0x717   : > { %1662 = vadd.xlane.f32.xlu1 %v1661_v38  ;;  %1659 = vadd.xlane.f32.xlu0 %v1658_v11  ;;  %v1857_v11 = vld [vmem:[#allocation3 + $0x50] sm:$0xff] }
 0x71b   : > { %1668 = vadd.xlane.f32.xlu1 %v1667_v6  ;;  %1665 = vadd.xlane.f32.xlu0 %v1664_v56 }
 0x71c   : > { %2271 = vmatpush3.bf16.xpose.msra.mxu0 %v2268_v7  ;;  %2296 = vmatpush3.bf16.xpose.msra.mxu1 %v2268_v7 }
 0x71d   : > { %2273 = vmatprep.subr.bf16.mxu0 %v2272_v46  ;;  %2289 = vmatprep.subr.bf16.mxu1 %v2272_v46 }
 0x724   : > { %2275 = vmatpush3.bf16.xpose.msra.mxu0 %v2272_v46  ;;  %2297 = vmatpush3.bf16.xpose.msra.mxu1 %v2272_v46 }
 0x725   : > { %2277 = vmatprep.subr.bf16.mxu0 %v2276_v60  ;;  %2290 = vmatprep.subr.bf16.mxu1 %v2276_v60 }
 0x72c   : > { %2279 = vmatpush3.bf16.xpose.msra.mxu0 %v2276_v60  ;;  %2298 = vmatpush3.bf16.xpose.msra.mxu1 %v2276_v60 }
 0x72d   : > { %2281 = vmatprep.subr.bf16.mxu0 %v2280_v19  ;;  %2291 = vmatprep.subr.bf16.mxu1 %v2280_v19 }
 0x734   : > { %2283 = vmatpush3.bf16.xpose.msra.mxu0 %v2280_v19  ;;  %2299 = vmatpush3.bf16.xpose.msra.mxu1 %v2280_v19  ;;  %v1860_v19 = vld [vmem:[#allocation3 + $0x68] sm:$0xff] }
 0x73b   : > { %2229 = vmatmul.mubr.f32.vlgmr.msra.gmra.mrb[0].mxu0 %v1671_v50  ;;  %2241 = vmatmul.mubr.f32.vlgmr.msra.gmra.mrb[0].mxu1 %v1679_v32 }
 0x73c   : > { %2231 = vmatprep.mubr.f32.mxu0 %v1672_v18  ;;  %2243 = vmatprep.mubr.f32.mxu1 %v1680_v3  ;;  %v1851_v3 = vld [vmem:[#allocation3 + $0x20] sm:$0xff] }
 0x73f   : > { %2232 = vmatmul.mubr.f32.gmra.mrb[2].mxu0 %v1673_v57  ;;  %2244 = vmatmul.mubr.f32.gmra.mrb[2].mxu1 %v1681_v63  ;;  %v1859_v63 = vld [vmem:[#allocation3 + $0x60] sm:$0xff] }
 0x740   : > { %2234 = vmatprep.mubr.f32.mxu0 %v1674_v61  ;;  %2246 = vmatprep.mubr.f32.mxu1 %v1682_v59 }
 0x743   : > { %2235 = vmatmul.mubr.f32.gmra.mrb[4].mxu0 %v1675_v15  ;;  %2247 = vmatmul.mubr.f32.gmra.mrb[4].mxu1 %v1683_v52 }
 0x744   : > { %2237 = vmatprep.mubr.f32.mxu0 %v1676_v26  ;;  %2249 = vmatprep.mubr.f32.mxu1 %v1684_v51 }
 0x747   : > { %2238 = vmatmul.mubr.f32.gmra.mrb[6].mxu0 %v1677_v39  ;;  %2250 = vmatmul.mubr.f32.gmra.mrb[6].mxu1 %v1685_v5 }
 0x78c   : > { %v1630_v42 = vpop.xlane.xlu1 %1629  ;;  %v1624_v28 = vpop.xlane.xlu0 %1623 }
 0x790   : > { %v1633_v29 = vpop.xlane.xlu1 %1632  ;;  %v1627_v54 = vpop.xlane.xlu0 %1626 }
 0x794   : > { %v1639_v58 = vpop.xlane.xlu1 %1638  ;;  %v1636_v48 = vpop.xlane.xlu0 %1635 }
 0x798   : > { %v3941_v4 = vpop.xlane.xlu1 %1644  ;;  %v3943_v20 = vpop.xlane.xlu0 %1641 }
 0x79c   : > { %v1651_v0 = vpop.xlane.xlu1 %1650  ;;  %v1648_v8 = vpop.xlane.xlu0 %1647 }
 0x7a0   : > { %v1657_v10 = vpop.xlane.xlu1 %1656  ;;  %v1654_v9 = vpop.xlane.xlu0 %1653 }
 0x7a4   : > { %v1663_v55 = vpop.xlane.xlu1 %1662  ;;  %v1660_v22 = vpop.xlane.xlu0 %1659 }
 0x7a8   : > { %v1669_v15 = vpop.xlane.xlu1 %1668  ;;  %v1666_v51 = vpop.xlane.xlu0 %1665 }
 0x80e   : > { %v2230_v40 = vpop.f32.mrb[0].mxu0  ;;  %v2242_v30 = vpop.f32.mrb[0].mxu1 }
 0x80f   : > { %v1864_v14 = vmul.f32 %v2230_v40, %v1627_v54  ;;  %v1872_v53 = vmul.f32 %v2242_v30, %v1651_v0  ;;  %v1768_v49 = vpop.f32.mrb[1].mxu0  ;;  %v1808_v7 = vpop.f32.mrb[1].mxu1  ;;  %v1862_v54 = vld [vmem:[#allocation3 + $0x78] sm:$0xff] }
 0x810   : > { %v1863_v25 = vmul.f32 %v1768_v49, %v1624_v28  ;;  %v1871_v23 = vmul.f32 %v1808_v7, %v1648_v8  ;;  %v1854_v28 = vld [vmem:[#allocation3 + $0x38] sm:$0xff] }
 0x811   : > { %v1880_v27 = vadd.f32 %v1864_v14, %v1848_v16  ;;  %v1888_v21 = vadd.f32 %v1872_v53, %v1856_v45 }
 0x812   : > { %v1879_v24 = vadd.f32 %v1863_v25, %v1847_v34  ;;  %v1887_v31 = vadd.f32 %v1871_v23, %v1855_v1  ;;  %v2233_v41 = vpop.f32.mrb[2].mxu0  ;;  %v2245_v2 = vpop.f32.mrb[2].mxu1 }
 0x813   : > { %1896 = vst [vmem:[#allocation3 + $0x8] sm:$0xff] %v1880_v27  ;;  %1904 = vst [vmem:[#allocation3 + $0x48] sm:$0xff] %v1888_v21  ;;  %v1866_v12 = vmul.f32 %v2233_v41, %v1633_v29  ;;  %v1874_v46 = vmul.f32 %v2245_v2, %v1657_v10  ;;  %v1778_v33 = vpop.f32.mrb[3].mxu0  ;;  %v1818_v38 = vpop.f32.mrb[3].mxu1  ;;  %v1853_v10 = vld [vmem:[#allocation3 + $0x30] sm:$0xff] }
 0x814   : > { %1895 = vst [vmem:[#allocation3] sm:$0xff] %v1879_v24  ;;  %1903 = vst [vmem:[#allocation3 + $0x40] sm:$0xff] %v1887_v31  ;;  %v1865_v44 = vmul.f32 %v1778_v33, %v1630_v42  ;;  %v1873_v35 = vmul.f32 %v1818_v38, %v1654_v9 }
 0x815   : > { %v1882_v62 = vadd.f32 %v1866_v12, %v1850_v17  ;;  %v1890_v37 = vadd.f32 %v1874_v46, %v1858_v36 }
 0x816   : > { %v1881_v6 = vadd.f32 %v1865_v44, %v1849_v13  ;;  %v1889_v56 = vadd.f32 %v1873_v35, %v1857_v11  ;;  %v2236_v60 = vpop.f32.mrb[4].mxu0  ;;  %v2248_v43 = vpop.f32.mrb[4].mxu1 }
 0x817   : > { %1898 = vst [vmem:[#allocation3 + $0x18] sm:$0xff] %v1882_v62  ;;  %1906 = vst [vmem:[#allocation3 + $0x58] sm:$0xff] %v1890_v37  ;;  %v1868_v50 = vmul.f32 %v2236_v60, %v1639_v58  ;;  %v1876_v32 = vmul.f32 %v2248_v43, %v1663_v55  ;;  %v1788_v18 = vpop.f32.mrb[5].mxu0  ;;  %v1828_v57 = vpop.f32.mrb[5].mxu1 }
 0x818   : > { %1897 = vst [vmem:[#allocation3 + $0x10] sm:$0xff] %v1881_v6  ;;  %1905 = vst [vmem:[#allocation3 + $0x50] sm:$0xff] %v1889_v56  ;;  %v1867_v61 = vmul.f32 %v1788_v18, %v1636_v48  ;;  %v1875_v59 = vmul.f32 %v1828_v57, %v1660_v22  ;;  %v1861_v48 = vld [vmem:[#allocation3 + $0x70] sm:$0xff] }
 0x819   : > { %v1884_v52 = vadd.f32 %v1868_v50, %v1852_v47  ;;  %v1892_v26 = vadd.f32 %v1876_v32, %v1860_v19 }
 0x81a   : > { %v1883_v39 = vadd.f32 %v1867_v61, %v1851_v3  ;;  %v1891_v5 = vadd.f32 %v1875_v59, %v1859_v63  ;;  %v2239_v42 = vpop.f32.mrb[6].mxu0  ;;  %v2251_v29 = vpop.f32.mrb[6].mxu1  ;;  %1914 = sbr.rel (%p2072_p11) target bundleno = 2090 (0x82a), region = 60  ;;  %v1916_v49 = vld [vmem:[#allocation3 + $0x8] sm:$0xff] (!%p2072_p11) }
 0x81b   : > { %1900 = vst [vmem:[#allocation3 + $0x28] sm:$0xff] %v1884_v52  ;;  %1908 = vst [vmem:[#allocation3 + $0x68] sm:$0xff] %v1892_v26  ;;  %v1870_v58 = vmul.f32 %v2239_v42, %v3941_v4  ;;  %v1878_v0 = vmul.f32 %v2251_v29, %v1669_v15  ;;  %v1798_v8 = vpop.f32.mrb[7].mxu0  ;;  %v1838_v9 = vpop.f32.mrb[7].mxu1  ;;  %v1915_v4 = vld [vmem:[#allocation3] sm:$0xff] (!%p2072_p11)  ;;  %v1924_v21 = vld [vmem:[#allocation3 + $0x48] sm:$0xff] (!%p2072_p11) }
 0x81c   : > { %1899 = vst [vmem:[#allocation3 + $0x20] sm:$0xff] %v1883_v39  ;;  %1907 = vst [vmem:[#allocation3 + $0x60] sm:$0xff] %v1891_v5  ;;  %v1869_v40 = vmul.f32 %v1798_v8, %v3943_v20  ;;  %v1877_v16 = vmul.f32 %v1838_v9, %v1666_v51  ;;  %v1923_v27 = vld [vmem:[#allocation3 + $0x40] sm:$0xff] (!%p2072_p11) }
 0x81d   : > { %v1886_v30 = vadd.f32 %v1870_v58, %v1854_v28  ;;  %v1894_v45 = vadd.f32 %v1878_v0, %v1862_v54  ;;  %1931 = vst [vmem:[#allocation10] sm:$0xff] (!%p2072_p11), %v1915_v4  ;;  %1932 = vst [vmem:[#allocation10 + $0x8] sm:$0xff] (!%p2072_p11), %v1916_v49 }
 0x81e   : > { %v1885_v14 = vadd.f32 %v1869_v40, %v1853_v10  ;;  %v1893_v53 = vadd.f32 %v1877_v16, %v1861_v48  ;;  %v1918_v7 = vld [vmem:[#allocation3 + $0x18] sm:$0xff] (!%p2072_p11)  ;;  %1939 = vst [vmem:[#allocation10 + $0x40] sm:$0xff] (!%p2072_p11), %v1923_v27  ;;  %1940 = vst [vmem:[#allocation10 + $0x48] sm:$0xff] (!%p2072_p11), %v1924_v21 }
 0x81f   : > { %1902 = vst [vmem:[#allocation3 + $0x38] sm:$0xff] %v1886_v30  ;;  %1910 = vst [vmem:[#allocation3 + $0x78] sm:$0xff] %v1894_v45  ;;  %v1917_v34 = vld [vmem:[#allocation3 + $0x10] sm:$0xff] (!%p2072_p11)  ;;  %v1926_v22 = vld [vmem:[#allocation3 + $0x58] sm:$0xff] (!%p2072_p11) }
 0x820   : > { %1901 = vst [vmem:[#allocation3 + $0x30] sm:$0xff] %v1885_v14  ;;  %1909 = vst [vmem:[#allocation3 + $0x70] sm:$0xff] %v1893_v53  ;;  %v1925_v55 = vld [vmem:[#allocation3 + $0x50] sm:$0xff] (!%p2072_p11) }
 0x821   : > { %1933 = vst [vmem:[#allocation10 + $0x10] sm:$0xff] %v1917_v34  ;;  %1934 = vst [vmem:[#allocation10 + $0x18] sm:$0xff] %v1918_v7 }
 0x822   : > { %v1920_v1 = vld [vmem:[#allocation3 + $0x28] sm:$0xff]  ;;  %1941 = vst [vmem:[#allocation10 + $0x50] sm:$0xff] %v1925_v55  ;;  %1942 = vst [vmem:[#allocation10 + $0x58] sm:$0xff] %v1926_v22 }
 0x823   : > { %v1919_v20 = vld [vmem:[#allocation3 + $0x20] sm:$0xff]  ;;  %1936 = vst [vmem:[#allocation10 + $0x28] sm:$0xff] %v1920_v1  ;;  %v1928_v31 = vld [vmem:[#allocation3 + $0x68] sm:$0xff] }
 0x824   : > { %1935 = vst [vmem:[#allocation10 + $0x20] sm:$0xff] %v1919_v20  ;;  %v1927_v24 = vld [vmem:[#allocation3 + $0x60] sm:$0xff]  ;;  %1944 = vst [vmem:[#allocation10 + $0x68] sm:$0xff] %v1928_v31 }
 0x825   : > { %1943 = vst [vmem:[#allocation10 + $0x60] sm:$0xff] %v1927_v24 }
 0x826   : > { %v1922_v23 = vld [vmem:[#allocation3 + $0x38] sm:$0xff] }
 0x827   : > { %v1921_v25 = vld [vmem:[#allocation3 + $0x30] sm:$0xff]  ;;  %1938 = vst [vmem:[#allocation10 + $0x38] sm:$0xff] %v1922_v23  ;;  %v1930_v17 = vld [vmem:[#allocation3 + $0x78] sm:$0xff] }
 0x828   : > { %1937 = vst [vmem:[#allocation10 + $0x30] sm:$0xff] %v1921_v25  ;;  %v1929_v41 = vld [vmem:[#allocation3 + $0x70] sm:$0xff]  ;;  %1946 = vst [vmem:[#allocation10 + $0x78] sm:$0xff] %v1930_v17 }
 0x829   : > { %1945 = vst [vmem:[#allocation10 + $0x70] sm:$0xff] %v1929_v41 }
 0x82a PF: > { %p2330_p0 = scmp.eq.s32.totalorder %s2694_s24, 3  ;;  %s2632_s21 = smov [#allocation10]  }
 0x82b   : > { %s1956_s9 = sshll.u32 %s2632_s21, 4  ;;  %s1957_s9 = int_to_ptr.vmem [resolvable:$true] %s1956_s9 }
 0x82c   : > { %s2537_s10 = scalar_lea.vmem %s1957_s9, 2048  ;;  %p2544_p1 = scmp.lt.s32.totalorder %s1957_s9, %s1957_s9 }
 0x82d   : > { %p2538_p3 = scmp.ne.s32.totalorder %s1957_s9, %s2537_s10  ;;  %p2545_p2 = scmp.lt.s32.totalorder %s2537_s10, %s2537_s10 }
 0x82f   : > { %p2539_p10 = pnand %p2538_p3, %p2330_p0  ;;  %p2546_p8 = por %p2545_p2, %p2544_p1 }
 0x831   : > { %p2540_p12 = pneg %p2539_p10 }
 0x833   : > { %p2547_p13 = pnand %p2546_p8, %p2540_p12 }
 0x835   : > { %2550 = shalt.err (!%p2547_p13)
}
 0x836   : > { %s2551_s18 = scalar_lea.hbm %s3994_s5, 2048 }
 0x837   : > { %p2552_p4 = scmp.ne.s32.totalorder %s3994_s5, %s2551_s18  ;;  %p2557_p7 = scmp.lt.u32.totalorder %s2551_s18, %s3994_s5 }
 0x839   : > { %p2553_p5 = pnand %p2552_p4, %p2330_p0 }
 0x83b   : > { %p2554_p6 = pneg %p2553_p5 }
 0x83d   : > { %p2559_p9 = pnand %p2557_p7, %p2554_p6 }
 0x83f   : > { %2562 = shalt.err (!%p2559_p9)
}
 0x840   : > { %s2633_s14 = smov 128   ;;  %s2634_s15 = smov 8  }
 0x841   : > { %2311 = dma.vmem_to_hbm [thread:$0]  (%p2330_p0), %s1957_s9, 2048, %s3994_s5, [#allocation6], %s2633_s14, %s2633_s14, %s2634_s15  }
 0x842   : > { %2600 = dma.done.wait (%p2330_p0), [#allocation6], 2048  }
 0x843   : > { %2602 = vsyncadd (%p2330_p0), [#allocation6], 4294965248 }
 0x844 PF: > { %s18_s23 = sadd.s32 1, %s2625_s23   ;;  %s4105_s18 = smov %s2609_s19 }
 0x845   : > { %p15_p11 = scmp.ge.s32.totalorder %s18_s23, 6   ;;  %s4106_s19 = smov %s2613_s20 }
 0x846   : > { %s4107_s20 = smov %s2786_s13  ;;  %s4108_s21 = smov %s2621_s22 }
 0x847   : > { %s4109_s22 = smov %s4111_s17  ;;  %17 = sbr.rel (!%p15_p11) target bundleno = 5 (0x5), region = 94 }
 0x84e   :  { %1972 = vsyncpa [#allocation5], 1 }
 0x84f   :  { %1974 = vsyncpa [#allocation5 + $0x1], 1 }
 0x850   :  { %1975 = vsyncpa [#allocation8], 1 }
 0x851   :  { %1976 = vsyncpa [#allocation6], 1 }
 0x852   :  { %1978 = vsyncpa [#allocation6 + $0x1], 1 }

</bundles_post_ra>
